<compile_context>
chip_gen: v5e
topology: v5e:2x2
jax: 0.10.0
libtpu: 0.0.40
codegen_flags: <defaults>
</compile_context>

<pallas_src>
import functools
import math

import jax
import jax.numpy as jnp
from jax import lax
from jax.experimental import pallas as pl
from jax.experimental.pallas import tpu as pltpu


_PARAM_NAMES = ["g1", "be1", "wqkv", "bqkv", "wo", "bo",
                "g2", "be2", "w1", "b1", "w2", "b2"]


def _layer_norm(x, gamma, beta, eps=1e-5):
    mu = jnp.mean(x, axis=-1, keepdims=True)
    var = jnp.mean((x - mu) ** 2, axis=-1, keepdims=True)
    return (x - mu) * lax.rsqrt(var + eps) * gamma + beta


def encoder_stack_kernel(x_ref,
                         g1_ref, be1_ref,
                         wqkv_ref, bqkv_ref,
                         wo_ref, bo_ref,
                         g2_ref, be2_ref,
                         w1_ref, b1_ref, w2_ref, b2_ref,
                         o_ref, *, nhead, seq, tb, bf16_softmax):
    l = pl.program_id(1)

    # First layer for this batch tile: seed the resident activation.
    @pl.when(l == 0)
    def _():
        o_ref[...] = x_ref[...]

    x = o_ref[...]                      # (tb*seq, D) f32, resident across layers
    _, D = x.shape
    hd = D // nhead

    # ---- src2 = norm1(src); src2 = self_attn(src2, src2) ----
    y = _layer_norm(x, g1_ref[0], be1_ref[0])
    qkv = jnp.dot(y.astype(jnp.bfloat16), wqkv_ref[0],
                  preferred_element_type=jnp.float32) + bqkv_ref[0]   # (R, 3D) f32
    qkv16 = qkv.astype(jnp.bfloat16)    # single cast; 1/sqrt(hd) folded into Wq
    q = qkv16[:, :D]
    k = qkv16[:, D:2 * D]
    v = qkv16[:, 2 * D:]
    wo16 = wo_ref[0]                    # (D, D) bf16
    bo = bo_ref[0]                      # (1, D) f32

    # Per-batch-element f32 accumulators for the output projection.
    accs = [jnp.zeros((seq, D), jnp.float32) for _ in range(tb)]
    for h in range(nhead):              # static unroll over heads
        lo = h * hd
        q_h = q[:, lo:lo + hd]
        k_h = k[:, lo:lo + hd]
        v_h = v[:, lo:lo + hd]
        wo_h = wo16[lo:lo + hd, :]      # (hd, D) bf16, sliced once per head
        for b in range(tb):             # attention never mixes batch elements
            r0 = b * seq
            q_bh = q_h[r0:r0 + seq]
            k_bh = k_h[r0:r0 + seq]
            v_bh = v_h[r0:r0 + seq]
            # q @ k^T by contracting the last dims (no materialized transpose).
            s = lax.dot_general(q_bh, k_bh, (((1,), (1,)), ((), ())),
                                preferred_element_type=jnp.float32)   # (S, S) f32
            z = s - jnp.max(s, axis=-1, keepdims=True)
            if bf16_softmax:            # v6e / v7x: bf16 EUP halves exp pressure
                p = jnp.exp(z.astype(jnp.bfloat16))
                denom = jnp.sum(p.astype(jnp.float32), axis=-1, keepdims=True)
            else:                       # v5e and older: no bf16 EUP path
                p_f = jnp.exp(z)
                denom = jnp.sum(p_f, axis=-1, keepdims=True)
                p = p_f.astype(jnp.bfloat16)
            ctx = jnp.dot(p, v_bh, preferred_element_type=jnp.float32)   # (S, hd)
            # Normalize the (S, hd) context instead of the (S, S) probabilities.
            ctx = ctx * pl.reciprocal(denom, approx=True)
            # Accumulate the output projection per head: lane-dense width-D MXU work.
            accs[b] = accs[b] + jnp.dot(ctx.astype(jnp.bfloat16), wo_h,
                                        preferred_element_type=jnp.float32)

    # src = src + dropout1(src2)   (dropout == identity at inference)
    # Assemble per-batch rows with full-width (lane-dense) row stores.
    for b in range(tb):
        r0 = b * seq
        o_ref[r0:r0 + seq, :] = x[r0:r0 + seq] + accs[b] + bo
    x = o_ref[...]

    # ---- src2 = norm2(src); src2 = linear2(dropout(linear1(src2))) ----
    # (NO activation between linear1 and linear2 — matches the reference forward.)
    y = _layer_norm(x, g2_ref[0], be2_ref[0])
    hdn = jnp.dot(y.astype(jnp.bfloat16), w1_ref[0],
                  preferred_element_type=jnp.float32) + b1_ref[0]
    ff = jnp.dot(hdn.astype(jnp.bfloat16), w2_ref[0],
                 preferred_element_type=jnp.float32) + b2_ref[0]

    # src = src + dropout2(src2)  -> next layer's input (stays resident in VMEM)
    o_ref[...] = x + ff


def _pick_tb(batch, seq, target_rows=256):
    """Largest batch tile that divides B, keeps tiles (8,*)-aligned and ~target_rows rows."""
    valid = [tb for tb in range(1, batch + 1)
             if batch % tb == 0 and (tb == batch or (tb * seq) % 8 == 0)]
    fitting = [tb for tb in valid if tb * seq <= max(seq, target_rows)]
    return max(fitting) if fitting else min(valid)


def _bf16_softmax_default():
    # bf16 EUP exists on v6e / v7x; anything else gets the always-correct f32 path.
    try:
        kind = jax.devices()[0].device_kind.lower()
    except Exception:
        return False
    return any(t in kind for t in ("v6", "v7", "tpu7", "7x"))


def transformer_encoder(x, stacked, nhead, *, batch_tile=None, bf16_softmax=None):
    B, S, D = x.shape
    L = stacked["wqkv"].shape[0]
    F = stacked["w1"].shape[-1]
    tb = batch_tile if batch_tile is not None else _pick_tb(B, S)
    assert B % tb == 0
    if bf16_softmax is None:
        bf16_softmax = _bf16_softmax_default()

    args = [stacked[n] for n in _PARAM_NAMES]

    def wspec(arr):
        _, a, b = arr.shape
        return pl.BlockSpec((1, a, b), lambda bb, l: (l, 0, 0))

    rows = tb * S
    in_specs = ([pl.BlockSpec((rows, D), lambda bb, l: (bb, 0))]
                + [wspec(a) for a in args])
    out_spec = pl.BlockSpec((rows, D), lambda bb, l: (bb, 0))

    # VMEM budget: double-buffered per-layer weights + resident activation block
    # + activation-sized temporaries; generous headroom, capped at the v7x
    # physical 64 MiB.  (At large D/F the FFN weights should be F-tiled instead
    # of relying on this cap — see TODO at top of file.)
    wbytes_layer = sum(int(a.size * a.dtype.itemsize) // L for a in args)
    act_bytes = rows * D * 4
    need = (2 * wbytes_layer          # double-buffered per-layer weights
            + 4 * act_bytes           # in/out activation block buffers
            + 10 * act_bytes          # qkv / LN / attention temporaries
            + 2 * rows * F * 4        # FFN hidden activation
            + 2 * S * S * 4           # live per-head score tile
            + (4 << 20))
    vmem_limit = int(min(max(need, 32 << 20), 64 << 20))

    flops = int(B * L * (8 * S * D * D + 4 * S * S * D + 4 * S * D * F))
    transcendentals = int(B * L * nhead * S * S)
    bytes_accessed = int((B // tb) * L * wbytes_layer + 2 * B * S * D * 4)

    out = pl.pallas_call(
        functools.partial(encoder_stack_kernel, nhead=nhead, seq=S, tb=tb,
                          bf16_softmax=bf16_softmax),
        out_shape=jax.ShapeDtypeStruct((B * S, D), jnp.float32),
        grid=(B // tb, L),
        in_specs=in_specs,
        out_specs=out_spec,
        compiler_params=pltpu.CompilerParams(
            dimension_semantics=("parallel", "arbitrary"),
            vmem_limit_bytes=vmem_limit),
        cost_estimate=pl.CostEstimate(flops=flops,
                                      transcendentals=transcendentals,
                                      bytes_accessed=bytes_accessed),
    )(x.reshape(B * S, D), *args)
    return out.reshape(B, S, D)


def init_stacked_params(key, num_layers, d_model, nhead, dim_feedforward):
    D, F = d_model, dim_feedforward
    hd = D // nhead
    scale = 1.0 / math.sqrt(hd)

    def lin_w(k, fan_in, fan_out):
        return jax.random.normal(k, (fan_in, fan_out), jnp.float32) / math.sqrt(fan_in)

    def vec(k, n, s=0.02):
        return s * jax.random.normal(k, (1, n), jnp.float32)

    per = {n: [] for n in _PARAM_NAMES}
    for layer in range(num_layers):
        ks = jax.random.split(jax.random.fold_in(key, layer), 6)
        wq = lin_w(ks[0], D, D); bq = vec(jax.random.fold_in(ks[0], 1), D)
        wk = lin_w(ks[1], D, D); bk = vec(jax.random.fold_in(ks[1], 1), D)
        wv = lin_w(ks[2], D, D); bv = vec(jax.random.fold_in(ks[2], 1), D)
        wo = lin_w(ks[3], D, D); bo = vec(jax.random.fold_in(ks[3], 1), D)
        w1 = lin_w(ks[4], D, F); b1 = vec(jax.random.fold_in(ks[4], 1), F)
        w2 = lin_w(ks[5], F, D); b2 = vec(jax.random.fold_in(ks[5], 1), D)

        per["g1"].append(jnp.ones((1, D), jnp.float32))
        per["be1"].append(jnp.zeros((1, D), jnp.float32))
        per["g2"].append(jnp.ones((1, D), jnp.float32))
        per["be2"].append(jnp.zeros((1, D), jnp.float32))
        # fuse Q|K|V into one projection; fold 1/sqrt(hd) into the Q part
        per["wqkv"].append(jnp.concatenate([wq * scale, wk, wv], axis=-1))
        per["bqkv"].append(jnp.concatenate([bq * scale, bk, bv], axis=-1))
        per["wo"].append(wo); per["bo"].append(bo)
        per["w1"].append(w1); per["b1"].append(b1)
        per["w2"].append(w2); per["b2"].append(b2)

    stacked = {n: jnp.stack(v, axis=0) for n, v in per.items()}
    # bf16 matmul operands; biases / LN params stay f32 (f32 accumulation in-kernel)
    for n in ("wqkv", "wo", "w1", "w2"):
        stacked[n] = stacked[n].astype(jnp.bfloat16)
    return stacked


def _reference_encoder(x, stacked, nhead):
    """Pure-JAX reference of the same math (f32), used only for a sanity check."""
    L, _, D3 = stacked["wqkv"].shape
    D = D3 // 3
    hd = D // nhead
    out = x
    for li in range(L):
        p = {n: stacked[n][li].astype(jnp.float32) for n in _PARAM_NAMES}
        y = _layer_norm(out, p["g1"], p["be1"])
        qkv = y @ p["wqkv"] + p["bqkv"]
        q, k, v = qkv[..., :D], qkv[..., D:2 * D], qkv[..., 2 * D:]
        heads = []
        for h in range(nhead):
            lo = h * hd
            s = jnp.einsum("bqd,bkd->bqk", q[..., lo:lo + hd], k[..., lo:lo + hd])
            pr = jax.nn.softmax(s, axis=-1)
            heads.append(jnp.einsum("bqk,bkd->bqd", pr, v[..., lo:lo + hd]))
        ctx = jnp.concatenate(heads, axis=-1)
        out = out + ctx @ p["wo"] + p["bo"]
        y = _layer_norm(out, p["g2"], p["be2"])
        out = out + (y @ p["w1"] + p["b1"]) @ p["w2"] + p["b2"]
    return out


if __name__ == "__main__":
    # small shapes consistent with the module's forward
    num_layers, d_model, nhead, dim_feedforward, dropout = 2, 32, 4, 64, 0.0
    B, S = 2, 8

    root = jax.random.PRNGKey(0)
    x = jax.random.normal(jax.random.fold_in(root, 123), (B, S, d_model), jnp.float32)
    params = init_stacked_params(jax.random.fold_in(root, 7),
                                 num_layers, d_model, nhead, dim_feedforward)

    out = transformer_encoder(x, params, nhead)
    out = jax.block_until_ready(out)
    assert out.shape == (B, S, d_model) and out.dtype == jnp.float32
    assert bool(jnp.isfinite(out).all())

    # loose sanity check against a pure-JAX reference (bf16 matmuls + approx
    # reciprocal in the kernel -> not bit-exact)
    ref = _reference_encoder(x, params, nhead)
    err = float(jnp.max(jnp.abs(out - ref)))
    assert err < 1e-1, f"max abs error vs reference: {err}"

    print("KERNEL_OK")
</pallas_src>

<mosaic_0001>
module attributes {stable_mosaic.version = 11 : i64} {
  func.func @encoder_stack_kernel(%arg0: i32, %arg1: i32, %arg2: memref<16x32xf32, #tpu.memory_space<vmem>>, %arg3: memref<1x1x32xf32, #tpu.memory_space<vmem>>, %arg4: memref<1x1x32xf32, #tpu.memory_space<vmem>>, %arg5: memref<1x32x96xbf16, #tpu.memory_space<vmem>>, %arg6: memref<1x1x96xf32, #tpu.memory_space<vmem>>, %arg7: memref<1x32x32xbf16, #tpu.memory_space<vmem>>, %arg8: memref<1x1x32xf32, #tpu.memory_space<vmem>>, %arg9: memref<1x1x32xf32, #tpu.memory_space<vmem>>, %arg10: memref<1x1x32xf32, #tpu.memory_space<vmem>>, %arg11: memref<1x32x64xbf16, #tpu.memory_space<vmem>>, %arg12: memref<1x1x64xf32, #tpu.memory_space<vmem>>, %arg13: memref<1x64x32xbf16, #tpu.memory_space<vmem>>, %arg14: memref<1x1x32xf32, #tpu.memory_space<vmem>>, %arg15: memref<16x32xf32, #tpu.memory_space<vmem>>) attributes {dimension_semantics = [#tpu.dimension_semantics<parallel>, #tpu.dimension_semantics<arbitrary>], iteration_bounds = array<i64: 1, 2>, scalar_prefetch = 0 : i64, scratch_operands = 0 : i64, tpu.core_type = #tpu.core_type<tc>, window_params = [{transform_indices = @transform_0, window_bounds = array<i64: 16, 32>}, {transform_indices = @transform_1, window_bounds = array<i64: 1, 1, 32>}, {transform_indices = @transform_2, window_bounds = array<i64: 1, 1, 32>}, {transform_indices = @transform_3, window_bounds = array<i64: 1, 32, 96>}, {transform_indices = @transform_4, window_bounds = array<i64: 1, 1, 96>}, {transform_indices = @transform_5, window_bounds = array<i64: 1, 32, 32>}, {transform_indices = @transform_6, window_bounds = array<i64: 1, 1, 32>}, {transform_indices = @transform_7, window_bounds = array<i64: 1, 1, 32>}, {transform_indices = @transform_8, window_bounds = array<i64: 1, 1, 32>}, {transform_indices = @transform_9, window_bounds = array<i64: 1, 32, 64>}, {transform_indices = @transform_10, window_bounds = array<i64: 1, 1, 64>}, {transform_indices = @transform_11, window_bounds = array<i64: 1, 64, 32>}, {transform_indices = @transform_12, window_bounds = array<i64: 1, 1, 32>}, {transform_indices = @transform_13, window_bounds = array<i64: 16, 32>}]} {
    %c0_i32 = arith.constant 0 : i32
    %0 = arith.cmpi eq, %arg1, %c0_i32 : i32
    %1 = arith.extui %0 : i1 to i32
    %c0_i32_0 = arith.constant 0 : i32
    %2 = arith.cmpi ne, %1, %c0_i32_0 : i32
    scf.if %2 {
      %c0_99 = arith.constant 0 : index
      %c0_100 = arith.constant 0 : index
      %271 = vector.load %arg2[%c0_99, %c0_100] : memref<16x32xf32, #tpu.memory_space<vmem>>, vector<16x32xf32>
      %c0_101 = arith.constant 0 : index
      %c0_102 = arith.constant 0 : index
      %272 = vector.load %arg15[%c0_101, %c0_102] : memref<16x32xf32, #tpu.memory_space<vmem>>, vector<16x32xf32>
      tpu.vector_store %arg15[%c0_101, %c0_102], %271 {strides = array<i32>} : memref<16x32xf32, #tpu.memory_space<vmem>>, vector<16x32xf32>,
    } else {
    }
    %c0 = arith.constant 0 : index
    %c0_1 = arith.constant 0 : index
    %3 = vector.load %arg15[%c0, %c0_1] : memref<16x32xf32, #tpu.memory_space<vmem>>, vector<16x32xf32>
    %c0_2 = arith.constant 0 : index
    %c0_3 = arith.constant 0 : index
    %c0_4 = arith.constant 0 : index
    %4 = vector.load %arg3[%c0_2, %c0_3, %c0_4] : memref<1x1x32xf32, #tpu.memory_space<vmem>>, vector<1x1x32xf32>
    %5 = vector.shape_cast %4 : vector<1x1x32xf32> to vector<1x32xf32>
    %c0_5 = arith.constant 0 : index
    %c0_6 = arith.constant 0 : index
    %c0_7 = arith.constant 0 : index
    %6 = vector.load %arg4[%c0_5, %c0_6, %c0_7] : memref<1x1x32xf32, #tpu.memory_space<vmem>>, vector<1x1x32xf32>
    %7 = vector.shape_cast %6 : vector<1x1x32xf32> to vector<1x32xf32>
    %cst = arith.constant dense<0.000000e+00> : vector<16xf32>
    %8 = vector.multi_reduction <add>, %3, %cst [1] : vector<16x32xf32> to vector<16xf32>
    %9 = vector.shape_cast %8 : vector<16xf32> to vector<16x1xf32>
    %cst_8 = arith.constant 3.200000e+01 : f32
    %10 = vector.broadcast %cst_8 : f32 to vector<16x1xf32>
    %11 = arith.divf %9, %10 : vector<16x1xf32>
    %12 = vector.broadcast %11 : vector<16x1xf32> to vector<16x32xf32>
    %13 = arith.subf %3, %12 : vector<16x32xf32>
    %14 = arith.mulf %13, %13 : vector<16x32xf32>
    %cst_9 = arith.constant dense<0.000000e+00> : vector<16xf32>
    %15 = vector.multi_reduction <add>, %14, %cst_9 [1] : vector<16x32xf32> to vector<16xf32>
    %16 = vector.shape_cast %15 : vector<16xf32> to vector<16x1xf32>
    %cst_10 = arith.constant 3.200000e+01 : f32
    %17 = vector.broadcast %cst_10 : f32 to vector<16x1xf32>
    %18 = arith.divf %16, %17 : vector<16x1xf32>
    %19 = vector.broadcast %11 : vector<16x1xf32> to vector<16x32xf32>
    %20 = arith.subf %3, %19 : vector<16x32xf32>
    %cst_11 = arith.constant 9.99999974E-6 : f32
    %21 = vector.broadcast %cst_11 : f32 to vector<16x1xf32>
    %22 = arith.addf %18, %21 : vector<16x1xf32>
    %23 = math.rsqrt %22 : vector<16x1xf32>
    %24 = vector.broadcast %23 : vector<16x1xf32> to vector<16x32xf32>
    %25 = arith.mulf %20, %24 : vector<16x32xf32>
    %26 = vector.broadcast %5 : vector<1x32xf32> to vector<16x32xf32>
    %27 = arith.mulf %25, %26 : vector<16x32xf32>
    %28 = vector.broadcast %7 : vector<1x32xf32> to vector<16x32xf32>
    %29 = arith.addf %27, %28 : vector<16x32xf32>
    %30 = arith.truncf %29 : vector<16x32xf32> to vector<16x32xbf16>
    %c0_12 = arith.constant 0 : index
    %c0_13 = arith.constant 0 : index
    %c0_14 = arith.constant 0 : index
    %31 = vector.load %arg5[%c0_12, %c0_13, %c0_14] : memref<1x32x96xbf16, #tpu.memory_space<vmem>>, vector<1x32x96xbf16>
    %32 = vector.shape_cast %31 : vector<1x32x96xbf16> to vector<32x96xbf16>
    %cst_15 = arith.constant dense<0.000000e+00> : vector<16x96xf32>
    %33 = tpu.matmul %30, %32, %cst_15 {dimension_numbers = #tpu.dot_dimension_numbers<[1], [0], [0], [1], [0, 0, 1, 1], [], []>} : vector<16x32xbf16>, vector<32x96xbf16>, vector<16x96xf32> -> vector<16x96xf32>
    %c0_16 = arith.constant 0 : index
    %c0_17 = arith.constant 0 : index
    %c0_18 = arith.constant 0 : index
    %34 = vector.load %arg6[%c0_16, %c0_17, %c0_18] : memref<1x1x96xf32, #tpu.memory_space<vmem>>, vector<1x1x96xf32>
    %35 = vector.shape_cast %34 : vector<1x1x96xf32> to vector<1x96xf32>
    %36 = vector.broadcast %35 : vector<1x96xf32> to vector<16x96xf32>
    %37 = arith.addf %33, %36 : vector<16x96xf32>
    %38 = arith.truncf %37 : vector<16x96xf32> to vector<16x96xbf16>
    %39 = vector.extract_strided_slice %38 {offsets = [0, 0], sizes = [16, 32], strides = [1, 1]} : vector<16x96xbf16> to vector<16x32xbf16>
    %40 = vector.extract_strided_slice %38 {offsets = [0, 32], sizes = [16, 32], strides = [1, 1]} : vector<16x96xbf16> to vector<16x32xbf16>
    %41 = vector.extract_strided_slice %38 {offsets = [0, 64], sizes = [16, 32], strides = [1, 1]} : vector<16x96xbf16> to vector<16x32xbf16>
    %c0_19 = arith.constant 0 : index
    %c0_20 = arith.constant 0 : index
    %c0_21 = arith.constant 0 : index
    %42 = vector.load %arg7[%c0_19, %c0_20, %c0_21] : memref<1x32x32xbf16, #tpu.memory_space<vmem>>, vector<1x32x32xbf16>
    %43 = vector.shape_cast %42 : vector<1x32x32xbf16> to vector<32x32xbf16>
    %c0_22 = arith.constant 0 : index
    %c0_23 = arith.constant 0 : index
    %c0_24 = arith.constant 0 : index
    %44 = vector.load %arg8[%c0_22, %c0_23, %c0_24] : memref<1x1x32xf32, #tpu.memory_space<vmem>>, vector<1x1x32xf32>
    %45 = vector.shape_cast %44 : vector<1x1x32xf32> to vector<1x32xf32>
    %cst_25 = arith.constant 0.000000e+00 : f32
    %46 = vector.broadcast %cst_25 : f32 to vector<8x32xf32>
    %cst_26 = arith.constant 0.000000e+00 : f32
    %47 = vector.broadcast %cst_26 : f32 to vector<8x32xf32>
    %48 = vector.extract_strided_slice %39 {offsets = [0, 0], sizes = [16, 8], strides = [1, 1]} : vector<16x32xbf16> to vector<16x8xbf16>
    %49 = vector.extract_strided_slice %40 {offsets = [0, 0], sizes = [16, 8], strides = [1, 1]} : vector<16x32xbf16> to vector<16x8xbf16>
    %50 = vector.extract_strided_slice %41 {offsets = [0, 0], sizes = [16, 8], strides = [1, 1]} : vector<16x32xbf16> to vector<16x8xbf16>
    %51 = vector.extract_strided_slice %43 {offsets = [0, 0], sizes = [8, 32], strides = [1, 1]} : vector<32x32xbf16> to vector<8x32xbf16>
    %52 = vector.extract_strided_slice %48 {offsets = [0, 0], sizes = [8, 8], strides = [1, 1]} : vector<16x8xbf16> to vector<8x8xbf16>
    %53 = vector.extract_strided_slice %49 {offsets = [0, 0], sizes = [8, 8], strides = [1, 1]} : vector<16x8xbf16> to vector<8x8xbf16>
    %54 = vector.extract_strided_slice %50 {offsets = [0, 0], sizes = [8, 8], strides = [1, 1]} : vector<16x8xbf16> to vector<8x8xbf16>
    %cst_27 = arith.constant dense<0.000000e+00> : vector<8x8xf32>
    %55 = tpu.matmul %52, %53, %cst_27 {dimension_numbers = #tpu.dot_dimension_numbers<[1], [1], [0], [0], [0, 0, 1, 0], [], []>} : vector<8x8xbf16>, vector<8x8xbf16>, vector<8x8xf32> -> vector<8x8xf32>
    %cst_28 = arith.constant dense<0xFF800000> : vector<8xf32>
    %56 = vector.multi_reduction <maximumf>, %55, %cst_28 [1] : vector<8x8xf32> to vector<8xf32>
    %57 = vector.shape_cast %56 : vector<8xf32> to vector<8x1xf32>
    %58 = vector.broadcast %57 : vector<8x1xf32> to vector<8x8xf32>
    %59 = arith.subf %55, %58 : vector<8x8xf32>
    %60 = math.exp %59 : vector<8x8xf32>
    %cst_29 = arith.constant dense<0.000000e+00> : vector<8xf32>
    %61 = vector.multi_reduction <add>, %60, %cst_29 [1] : vector<8x8xf32> to vector<8xf32>
    %62 = vector.shape_cast %61 : vector<8xf32> to vector<8x1xf32>
    %63 = arith.truncf %60 : vector<8x8xf32> to vector<8x8xbf16>
    %cst_30 = arith.constant dense<0.000000e+00> : vector<8x8xf32>
    %64 = tpu.matmul %63, %54, %cst_30 {dimension_numbers = #tpu.dot_dimension_numbers<[1], [0], [0], [1], [0, 0, 1, 1], [], []>} : vector<8x8xbf16>, vector<8x8xbf16>, vector<8x8xf32> -> vector<8x8xf32>
    %65 = tpu.reciprocal %62 {approx = true} : vector<8x1xf32> -> vector<8x1xf32>
    %66 = vector.broadcast %65 : vector<8x1xf32> to vector<8x8xf32>
    %67 = arith.mulf %64, %66 : vector<8x8xf32>
    %68 = arith.truncf %67 : vector<8x8xf32> to vector<8x8xbf16>
    %cst_31 = arith.constant dense<0.000000e+00> : vector<8x32xf32>
    %69 = tpu.matmul %68, %51, %cst_31 {dimension_numbers = #tpu.dot_dimension_numbers<[1], [0], [0], [1], [0, 0, 1, 1], [], []>} : vector<8x8xbf16>, vector<8x32xbf16>, vector<8x32xf32> -> vector<8x32xf32>
    %70 = arith.addf %46, %69 : vector<8x32xf32>
    %71 = vector.extract_strided_slice %48 {offsets = [8, 0], sizes = [8, 8], strides = [1, 1]} : vector<16x8xbf16> to vector<8x8xbf16>
    %72 = vector.extract_strided_slice %49 {offsets = [8, 0], sizes = [8, 8], strides = [1, 1]} : vector<16x8xbf16> to vector<8x8xbf16>
    %73 = vector.extract_strided_slice %50 {offsets = [8, 0], sizes = [8, 8], strides = [1, 1]} : vector<16x8xbf16> to vector<8x8xbf16>
    %cst_32 = arith.constant dense<0.000000e+00> : vector<8x8xf32>
    %74 = tpu.matmul %71, %72, %cst_32 {dimension_numbers = #tpu.dot_dimension_numbers<[1], [1], [0], [0], [0, 0, 1, 0], [], []>} : vector<8x8xbf16>, vector<8x8xbf16>, vector<8x8xf32> -> vector<8x8xf32>
    %cst_33 = arith.constant dense<0xFF800000> : vector<8xf32>
    %75 = vector.multi_reduction <maximumf>, %74, %cst_33 [1] : vector<8x8xf32> to vector<8xf32>
    %76 = vector.shape_cast %75 : vector<8xf32> to vector<8x1xf32>
    %77 = vector.broadcast %76 : vector<8x1xf32> to vector<8x8xf32>
    %78 = arith.subf %74, %77 : vector<8x8xf32>
    %79 = math.exp %78 : vector<8x8xf32>
    %cst_34 = arith.constant dense<0.000000e+00> : vector<8xf32>
    %80 = vector.multi_reduction <add>, %79, %cst_34 [1] : vector<8x8xf32> to vector<8xf32>
    %81 = vector.shape_cast %80 : vector<8xf32> to vector<8x1xf32>
    %82 = arith.truncf %79 : vector<8x8xf32> to vector<8x8xbf16>
    %cst_35 = arith.constant dense<0.000000e+00> : vector<8x8xf32>
    %83 = tpu.matmul %82, %73, %cst_35 {dimension_numbers = #tpu.dot_dimension_numbers<[1], [0], [0], [1], [0, 0, 1, 1], [], []>} : vector<8x8xbf16>, vector<8x8xbf16>, vector<8x8xf32> -> vector<8x8xf32>
    %84 = tpu.reciprocal %81 {approx = true} : vector<8x1xf32> -> vector<8x1xf32>
    %85 = vector.broadcast %84 : vector<8x1xf32> to vector<8x8xf32>
    %86 = arith.mulf %83, %85 : vector<8x8xf32>
    %87 = arith.truncf %86 : vector<8x8xf32> to vector<8x8xbf16>
    %cst_36 = arith.constant dense<0.000000e+00> : vector<8x32xf32>
    %88 = tpu.matmul %87, %51, %cst_36 {dimension_numbers = #tpu.dot_dimension_numbers<[1], [0], [0], [1], [0, 0, 1, 1], [], []>} : vector<8x8xbf16>, vector<8x32xbf16>, vector<8x32xf32> -> vector<8x32xf32>
    %89 = arith.addf %47, %88 : vector<8x32xf32>
    %90 = vector.extract_strided_slice %39 {offsets = [0, 8], sizes = [16, 8], strides = [1, 1]} : vector<16x32xbf16> to vector<16x8xbf16>
    %91 = vector.extract_strided_slice %40 {offsets = [0, 8], sizes = [16, 8], strides = [1, 1]} : vector<16x32xbf16> to vector<16x8xbf16>
    %92 = vector.extract_strided_slice %41 {offsets = [0, 8], sizes = [16, 8], strides = [1, 1]} : vector<16x32xbf16> to vector<16x8xbf16>
    %93 = vector.extract_strided_slice %43 {offsets = [8, 0], sizes = [8, 32], strides = [1, 1]} : vector<32x32xbf16> to vector<8x32xbf16>
    %94 = vector.extract_strided_slice %90 {offsets = [0, 0], sizes = [8, 8], strides = [1, 1]} : vector<16x8xbf16> to vector<8x8xbf16>
    %95 = vector.extract_strided_slice %91 {offsets = [0, 0], sizes = [8, 8], strides = [1, 1]} : vector<16x8xbf16> to vector<8x8xbf16>
    %96 = vector.extract_strided_slice %92 {offsets = [0, 0], sizes = [8, 8], strides = [1, 1]} : vector<16x8xbf16> to vector<8x8xbf16>
    %cst_37 = arith.constant dense<0.000000e+00> : vector<8x8xf32>
    %97 = tpu.matmul %94, %95, %cst_37 {dimension_numbers = #tpu.dot_dimension_numbers<[1], [1], [0], [0], [0, 0, 1, 0], [], []>} : vector<8x8xbf16>, vector<8x8xbf16>, vector<8x8xf32> -> vector<8x8xf32>
    %cst_38 = arith.constant dense<0xFF800000> : vector<8xf32>
    %98 = vector.multi_reduction <maximumf>, %97, %cst_38 [1] : vector<8x8xf32> to vector<8xf32>
    %99 = vector.shape_cast %98 : vector<8xf32> to vector<8x1xf32>
    %100 = vector.broadcast %99 : vector<8x1xf32> to vector<8x8xf32>
    %101 = arith.subf %97, %100 : vector<8x8xf32>
    %102 = math.exp %101 : vector<8x8xf32>
    %cst_39 = arith.constant dense<0.000000e+00> : vector<8xf32>
    %103 = vector.multi_reduction <add>, %102, %cst_39 [1] : vector<8x8xf32> to vector<8xf32>
    %104 = vector.shape_cast %103 : vector<8xf32> to vector<8x1xf32>
    %105 = arith.truncf %102 : vector<8x8xf32> to vector<8x8xbf16>
    %cst_40 = arith.constant dense<0.000000e+00> : vector<8x8xf32>
    %106 = tpu.matmul %105, %96, %cst_40 {dimension_numbers = #tpu.dot_dimension_numbers<[1], [0], [0], [1], [0, 0, 1, 1], [], []>} : vector<8x8xbf16>, vector<8x8xbf16>, vector<8x8xf32> -> vector<8x8xf32>
    %107 = tpu.reciprocal %104 {approx = true} : vector<8x1xf32> -> vector<8x1xf32>
    %108 = vector.broadcast %107 : vector<8x1xf32> to vector<8x8xf32>
    %109 = arith.mulf %106, %108 : vector<8x8xf32>
    %110 = arith.truncf %109 : vector<8x8xf32> to vector<8x8xbf16>
    %cst_41 = arith.constant dense<0.000000e+00> : vector<8x32xf32>
    %111 = tpu.matmul %110, %93, %cst_41 {dimension_numbers = #tpu.dot_dimension_numbers<[1], [0], [0], [1], [0, 0, 1, 1], [], []>} : vector<8x8xbf16>, vector<8x32xbf16>, vector<8x32xf32> -> vector<8x32xf32>
    %112 = arith.addf %70, %111 : vector<8x32xf32>
    %113 = vector.extract_strided_slice %90 {offsets = [8, 0], sizes = [8, 8], strides = [1, 1]} : vector<16x8xbf16> to vector<8x8xbf16>
    %114 = vector.extract_strided_slice %91 {offsets = [8, 0], sizes = [8, 8], strides = [1, 1]} : vector<16x8xbf16> to vector<8x8xbf16>
    %115 = vector.extract_strided_slice %92 {offsets = [8, 0], sizes = [8, 8], strides = [1, 1]} : vector<16x8xbf16> to vector<8x8xbf16>
    %cst_42 = arith.constant dense<0.000000e+00> : vector<8x8xf32>
    %116 = tpu.matmul %113, %114, %cst_42 {dimension_numbers = #tpu.dot_dimension_numbers<[1], [1], [0], [0], [0, 0, 1, 0], [], []>} : vector<8x8xbf16>, vector<8x8xbf16>, vector<8x8xf32> -> vector<8x8xf32>
    %cst_43 = arith.constant dense<0xFF800000> : vector<8xf32>
    %117 = vector.multi_reduction <maximumf>, %116, %cst_43 [1] : vector<8x8xf32> to vector<8xf32>
    %118 = vector.shape_cast %117 : vector<8xf32> to vector<8x1xf32>
    %119 = vector.broadcast %118 : vector<8x1xf32> to vector<8x8xf32>
    %120 = arith.subf %116, %119 : vector<8x8xf32>
    %121 = math.exp %120 : vector<8x8xf32>
    %cst_44 = arith.constant dense<0.000000e+00> : vector<8xf32>
    %122 = vector.multi_reduction <add>, %121, %cst_44 [1] : vector<8x8xf32> to vector<8xf32>
    %123 = vector.shape_cast %122 : vector<8xf32> to vector<8x1xf32>
    %124 = arith.truncf %121 : vector<8x8xf32> to vector<8x8xbf16>
    %cst_45 = arith.constant dense<0.000000e+00> : vector<8x8xf32>
    %125 = tpu.matmul %124, %115, %cst_45 {dimension_numbers = #tpu.dot_dimension_numbers<[1], [0], [0], [1], [0, 0, 1, 1], [], []>} : vector<8x8xbf16>, vector<8x8xbf16>, vector<8x8xf32> -> vector<8x8xf32>
    %126 = tpu.reciprocal %123 {approx = true} : vector<8x1xf32> -> vector<8x1xf32>
    %127 = vector.broadcast %126 : vector<8x1xf32> to vector<8x8xf32>
    %128 = arith.mulf %125, %127 : vector<8x8xf32>
    %129 = arith.truncf %128 : vector<8x8xf32> to vector<8x8xbf16>
    %cst_46 = arith.constant dense<0.000000e+00> : vector<8x32xf32>
    %130 = tpu.matmul %129, %93, %cst_46 {dimension_numbers = #tpu.dot_dimension_numbers<[1], [0], [0], [1], [0, 0, 1, 1], [], []>} : vector<8x8xbf16>, vector<8x32xbf16>, vector<8x32xf32> -> vector<8x32xf32>
    %131 = arith.addf %89, %130 : vector<8x32xf32>
    %132 = vector.extract_strided_slice %39 {offsets = [0, 16], sizes = [16, 8], strides = [1, 1]} : vector<16x32xbf16> to vector<16x8xbf16>
    %133 = vector.extract_strided_slice %40 {offsets = [0, 16], sizes = [16, 8], strides = [1, 1]} : vector<16x32xbf16> to vector<16x8xbf16>
    %134 = vector.extract_strided_slice %41 {offsets = [0, 16], sizes = [16, 8], strides = [1, 1]} : vector<16x32xbf16> to vector<16x8xbf16>
    %135 = vector.extract_strided_slice %43 {offsets = [16, 0], sizes = [8, 32], strides = [1, 1]} : vector<32x32xbf16> to vector<8x32xbf16>
    %136 = vector.extract_strided_slice %132 {offsets = [0, 0], sizes = [8, 8], strides = [1, 1]} : vector<16x8xbf16> to vector<8x8xbf16>
    %137 = vector.extract_strided_slice %133 {offsets = [0, 0], sizes = [8, 8], strides = [1, 1]} : vector<16x8xbf16> to vector<8x8xbf16>
    %138 = vector.extract_strided_slice %134 {offsets = [0, 0], sizes = [8, 8], strides = [1, 1]} : vector<16x8xbf16> to vector<8x8xbf16>
    %cst_47 = arith.constant dense<0.000000e+00> : vector<8x8xf32>
    %139 = tpu.matmul %136, %137, %cst_47 {dimension_numbers = #tpu.dot_dimension_numbers<[1], [1], [0], [0], [0, 0, 1, 0], [], []>} : vector<8x8xbf16>, vector<8x8xbf16>, vector<8x8xf32> -> vector<8x8xf32>
    %cst_48 = arith.constant dense<0xFF800000> : vector<8xf32>
    %140 = vector.multi_reduction <maximumf>, %139, %cst_48 [1] : vector<8x8xf32> to vector<8xf32>
    %141 = vector.shape_cast %140 : vector<8xf32> to vector<8x1xf32>
    %142 = vector.broadcast %141 : vector<8x1xf32> to vector<8x8xf32>
    %143 = arith.subf %139, %142 : vector<8x8xf32>
    %144 = math.exp %143 : vector<8x8xf32>
    %cst_49 = arith.constant dense<0.000000e+00> : vector<8xf32>
    %145 = vector.multi_reduction <add>, %144, %cst_49 [1] : vector<8x8xf32> to vector<8xf32>
    %146 = vector.shape_cast %145 : vector<8xf32> to vector<8x1xf32>
    %147 = arith.truncf %144 : vector<8x8xf32> to vector<8x8xbf16>
    %cst_50 = arith.constant dense<0.000000e+00> : vector<8x8xf32>
    %148 = tpu.matmul %147, %138, %cst_50 {dimension_numbers = #tpu.dot_dimension_numbers<[1], [0], [0], [1], [0, 0, 1, 1], [], []>} : vector<8x8xbf16>, vector<8x8xbf16>, vector<8x8xf32> -> vector<8x8xf32>
    %149 = tpu.reciprocal %146 {approx = true} : vector<8x1xf32> -> vector<8x1xf32>
    %150 = vector.broadcast %149 : vector<8x1xf32> to vector<8x8xf32>
    %151 = arith.mulf %148, %150 : vector<8x8xf32>
    %152 = arith.truncf %151 : vector<8x8xf32> to vector<8x8xbf16>
    %cst_51 = arith.constant dense<0.000000e+00> : vector<8x32xf32>
    %153 = tpu.matmul %152, %135, %cst_51 {dimension_numbers = #tpu.dot_dimension_numbers<[1], [0], [0], [1], [0, 0, 1, 1], [], []>} : vector<8x8xbf16>, vector<8x32xbf16>, vector<8x32xf32> -> vector<8x32xf32>
    %154 = arith.addf %112, %153 : vector<8x32xf32>
    %155 = vector.extract_strided_slice %132 {offsets = [8, 0], sizes = [8, 8], strides = [1, 1]} : vector<16x8xbf16> to vector<8x8xbf16>
    %156 = vector.extract_strided_slice %133 {offsets = [8, 0], sizes = [8, 8], strides = [1, 1]} : vector<16x8xbf16> to vector<8x8xbf16>
    %157 = vector.extract_strided_slice %134 {offsets = [8, 0], sizes = [8, 8], strides = [1, 1]} : vector<16x8xbf16> to vector<8x8xbf16>
    %cst_52 = arith.constant dense<0.000000e+00> : vector<8x8xf32>
    %158 = tpu.matmul %155, %156, %cst_52 {dimension_numbers = #tpu.dot_dimension_numbers<[1], [1], [0], [0], [0, 0, 1, 0], [], []>} : vector<8x8xbf16>, vector<8x8xbf16>, vector<8x8xf32> -> vector<8x8xf32>
    %cst_53 = arith.constant dense<0xFF800000> : vector<8xf32>
    %159 = vector.multi_reduction <maximumf>, %158, %cst_53 [1] : vector<8x8xf32> to vector<8xf32>
    %160 = vector.shape_cast %159 : vector<8xf32> to vector<8x1xf32>
    %161 = vector.broadcast %160 : vector<8x1xf32> to vector<8x8xf32>
    %162 = arith.subf %158, %161 : vector<8x8xf32>
    %163 = math.exp %162 : vector<8x8xf32>
    %cst_54 = arith.constant dense<0.000000e+00> : vector<8xf32>
    %164 = vector.multi_reduction <add>, %163, %cst_54 [1] : vector<8x8xf32> to vector<8xf32>
    %165 = vector.shape_cast %164 : vector<8xf32> to vector<8x1xf32>
    %166 = arith.truncf %163 : vector<8x8xf32> to vector<8x8xbf16>
    %cst_55 = arith.constant dense<0.000000e+00> : vector<8x8xf32>
    %167 = tpu.matmul %166, %157, %cst_55 {dimension_numbers = #tpu.dot_dimension_numbers<[1], [0], [0], [1], [0, 0, 1, 1], [], []>} : vector<8x8xbf16>, vector<8x8xbf16>, vector<8x8xf32> -> vector<8x8xf32>
    %168 = tpu.reciprocal %165 {approx = true} : vector<8x1xf32> -> vector<8x1xf32>
    %169 = vector.broadcast %168 : vector<8x1xf32> to vector<8x8xf32>
    %170 = arith.mulf %167, %169 : vector<8x8xf32>
    %171 = arith.truncf %170 : vector<8x8xf32> to vector<8x8xbf16>
    %cst_56 = arith.constant dense<0.000000e+00> : vector<8x32xf32>
    %172 = tpu.matmul %171, %135, %cst_56 {dimension_numbers = #tpu.dot_dimension_numbers<[1], [0], [0], [1], [0, 0, 1, 1], [], []>} : vector<8x8xbf16>, vector<8x32xbf16>, vector<8x32xf32> -> vector<8x32xf32>
    %173 = arith.addf %131, %172 : vector<8x32xf32>
    %174 = vector.extract_strided_slice %39 {offsets = [0, 24], sizes = [16, 8], strides = [1, 1]} : vector<16x32xbf16> to vector<16x8xbf16>
    %175 = vector.extract_strided_slice %40 {offsets = [0, 24], sizes = [16, 8], strides = [1, 1]} : vector<16x32xbf16> to vector<16x8xbf16>
    %176 = vector.extract_strided_slice %41 {offsets = [0, 24], sizes = [16, 8], strides = [1, 1]} : vector<16x32xbf16> to vector<16x8xbf16>
    %177 = vector.extract_strided_slice %43 {offsets = [24, 0], sizes = [8, 32], strides = [1, 1]} : vector<32x32xbf16> to vector<8x32xbf16>
    %178 = vector.extract_strided_slice %174 {offsets = [0, 0], sizes = [8, 8], strides = [1, 1]} : vector<16x8xbf16> to vector<8x8xbf16>
    %179 = vector.extract_strided_slice %175 {offsets = [0, 0], sizes = [8, 8], strides = [1, 1]} : vector<16x8xbf16> to vector<8x8xbf16>
    %180 = vector.extract_strided_slice %176 {offsets = [0, 0], sizes = [8, 8], strides = [1, 1]} : vector<16x8xbf16> to vector<8x8xbf16>
    %cst_57 = arith.constant dense<0.000000e+00> : vector<8x8xf32>
    %181 = tpu.matmul %178, %179, %cst_57 {dimension_numbers = #tpu.dot_dimension_numbers<[1], [1], [0], [0], [0, 0, 1, 0], [], []>} : vector<8x8xbf16>, vector<8x8xbf16>, vector<8x8xf32> -> vector<8x8xf32>
    %cst_58 = arith.constant dense<0xFF800000> : vector<8xf32>
    %182 = vector.multi_reduction <maximumf>, %181, %cst_58 [1] : vector<8x8xf32> to vector<8xf32>
    %183 = vector.shape_cast %182 : vector<8xf32> to vector<8x1xf32>
    %184 = vector.broadcast %183 : vector<8x1xf32> to vector<8x8xf32>
    %185 = arith.subf %181, %184 : vector<8x8xf32>
    %186 = math.exp %185 : vector<8x8xf32>
    %cst_59 = arith.constant dense<0.000000e+00> : vector<8xf32>
    %187 = vector.multi_reduction <add>, %186, %cst_59 [1] : vector<8x8xf32> to vector<8xf32>
    %188 = vector.shape_cast %187 : vector<8xf32> to vector<8x1xf32>
    %189 = arith.truncf %186 : vector<8x8xf32> to vector<8x8xbf16>
    %cst_60 = arith.constant dense<0.000000e+00> : vector<8x8xf32>
    %190 = tpu.matmul %189, %180, %cst_60 {dimension_numbers = #tpu.dot_dimension_numbers<[1], [0], [0], [1], [0, 0, 1, 1], [], []>} : vector<8x8xbf16>, vector<8x8xbf16>, vector<8x8xf32> -> vector<8x8xf32>
    %191 = tpu.reciprocal %188 {approx = true} : vector<8x1xf32> -> vector<8x1xf32>
    %192 = vector.broadcast %191 : vector<8x1xf32> to vector<8x8xf32>
    %193 = arith.mulf %190, %192 : vector<8x8xf32>
    %194 = arith.truncf %193 : vector<8x8xf32> to vector<8x8xbf16>
    %cst_61 = arith.constant dense<0.000000e+00> : vector<8x32xf32>
    %195 = tpu.matmul %194, %177, %cst_61 {dimension_numbers = #tpu.dot_dimension_numbers<[1], [0], [0], [1], [0, 0, 1, 1], [], []>} : vector<8x8xbf16>, vector<8x32xbf16>, vector<8x32xf32> -> vector<8x32xf32>
    %196 = arith.addf %154, %195 : vector<8x32xf32>
    %197 = vector.extract_strided_slice %174 {offsets = [8, 0], sizes = [8, 8], strides = [1, 1]} : vector<16x8xbf16> to vector<8x8xbf16>
    %198 = vector.extract_strided_slice %175 {offsets = [8, 0], sizes = [8, 8], strides = [1, 1]} : vector<16x8xbf16> to vector<8x8xbf16>
    %199 = vector.extract_strided_slice %176 {offsets = [8, 0], sizes = [8, 8], strides = [1, 1]} : vector<16x8xbf16> to vector<8x8xbf16>
    %cst_62 = arith.constant dense<0.000000e+00> : vector<8x8xf32>
    %200 = tpu.matmul %197, %198, %cst_62 {dimension_numbers = #tpu.dot_dimension_numbers<[1], [1], [0], [0], [0, 0, 1, 0], [], []>} : vector<8x8xbf16>, vector<8x8xbf16>, vector<8x8xf32> -> vector<8x8xf32>
    %cst_63 = arith.constant dense<0xFF800000> : vector<8xf32>
    %201 = vector.multi_reduction <maximumf>, %200, %cst_63 [1] : vector<8x8xf32> to vector<8xf32>
    %202 = vector.shape_cast %201 : vector<8xf32> to vector<8x1xf32>
    %203 = vector.broadcast %202 : vector<8x1xf32> to vector<8x8xf32>
    %204 = arith.subf %200, %203 : vector<8x8xf32>
    %205 = math.exp %204 : vector<8x8xf32>
    %cst_64 = arith.constant dense<0.000000e+00> : vector<8xf32>
    %206 = vector.multi_reduction <add>, %205, %cst_64 [1] : vector<8x8xf32> to vector<8xf32>
    %207 = vector.shape_cast %206 : vector<8xf32> to vector<8x1xf32>
    %208 = arith.truncf %205 : vector<8x8xf32> to vector<8x8xbf16>
    %cst_65 = arith.constant dense<0.000000e+00> : vector<8x8xf32>
    %209 = tpu.matmul %208, %199, %cst_65 {dimension_numbers = #tpu.dot_dimension_numbers<[1], [0], [0], [1], [0, 0, 1, 1], [], []>} : vector<8x8xbf16>, vector<8x8xbf16>, vector<8x8xf32> -> vector<8x8xf32>
    %210 = tpu.reciprocal %207 {approx = true} : vector<8x1xf32> -> vector<8x1xf32>
    %211 = vector.broadcast %210 : vector<8x1xf32> to vector<8x8xf32>
    %212 = arith.mulf %209, %211 : vector<8x8xf32>
    %213 = arith.truncf %212 : vector<8x8xf32> to vector<8x8xbf16>
    %cst_66 = arith.constant dense<0.000000e+00> : vector<8x32xf32>
    %214 = tpu.matmul %213, %177, %cst_66 {dimension_numbers = #tpu.dot_dimension_numbers<[1], [0], [0], [1], [0, 0, 1, 1], [], []>} : vector<8x8xbf16>, vector<8x32xbf16>, vector<8x32xf32> -> vector<8x32xf32>
    %215 = arith.addf %173, %214 : vector<8x32xf32>
    %216 = vector.extract_strided_slice %3 {offsets = [0, 0], sizes = [8, 32], strides = [1, 1]} : vector<16x32xf32> to vector<8x32xf32>
    %217 = arith.addf %216, %196 : vector<8x32xf32>
    %218 = vector.broadcast %45 : vector<1x32xf32> to vector<8x32xf32>
    %219 = arith.addf %217, %218 : vector<8x32xf32>
    %c0_67 = arith.constant 0 : index
    %c0_68 = arith.constant 0 : index
    %220 = vector.load %arg15[%c0_67, %c0_68] : memref<16x32xf32, #tpu.memory_space<vmem>>, vector<8x32xf32>
    tpu.vector_store %arg15[%c0_67, %c0_68], %219 {strides = array<i32>} : memref<16x32xf32, #tpu.memory_space<vmem>>, vector<8x32xf32>,
    %221 = vector.extract_strided_slice %3 {offsets = [8, 0], sizes = [8, 32], strides = [1, 1]} : vector<16x32xf32> to vector<8x32xf32>
    %222 = arith.addf %221, %215 : vector<8x32xf32>
    %223 = vector.broadcast %45 : vector<1x32xf32> to vector<8x32xf32>
    %224 = arith.addf %222, %223 : vector<8x32xf32>
    %c8 = arith.constant 8 : index
    %c0_69 = arith.constant 0 : index
    %225 = vector.load %arg15[%c8, %c0_69] : memref<16x32xf32, #tpu.memory_space<vmem>>, vector<8x32xf32>
    tpu.vector_store %arg15[%c8, %c0_69], %224 {strides = array<i32>} : memref<16x32xf32, #tpu.memory_space<vmem>>, vector<8x32xf32>,
    %c0_70 = arith.constant 0 : index
    %c0_71 = arith.constant 0 : index
    %226 = vector.load %arg15[%c0_70, %c0_71] : memref<16x32xf32, #tpu.memory_space<vmem>>, vector<16x32xf32>
    %c0_72 = arith.constant 0 : index
    %c0_73 = arith.constant 0 : index
    %c0_74 = arith.constant 0 : index
    %227 = vector.load %arg9[%c0_72, %c0_73, %c0_74] : memref<1x1x32xf32, #tpu.memory_space<vmem>>, vector<1x1x32xf32>
    %228 = vector.shape_cast %227 : vector<1x1x32xf32> to vector<1x32xf32>
    %c0_75 = arith.constant 0 : index
    %c0_76 = arith.constant 0 : index
    %c0_77 = arith.constant 0 : index
    %229 = vector.load %arg10[%c0_75, %c0_76, %c0_77] : memref<1x1x32xf32, #tpu.memory_space<vmem>>, vector<1x1x32xf32>
    %230 = vector.shape_cast %229 : vector<1x1x32xf32> to vector<1x32xf32>
    %cst_78 = arith.constant dense<0.000000e+00> : vector<16xf32>
    %231 = vector.multi_reduction <add>, %226, %cst_78 [1] : vector<16x32xf32> to vector<16xf32>
    %232 = vector.shape_cast %231 : vector<16xf32> to vector<16x1xf32>
    %cst_79 = arith.constant 3.200000e+01 : f32
    %233 = vector.broadcast %cst_79 : f32 to vector<16x1xf32>
    %234 = arith.divf %232, %233 : vector<16x1xf32>
    %235 = vector.broadcast %234 : vector<16x1xf32> to vector<16x32xf32>
    %236 = arith.subf %226, %235 : vector<16x32xf32>
    %237 = arith.mulf %236, %236 : vector<16x32xf32>
    %cst_80 = arith.constant dense<0.000000e+00> : vector<16xf32>
    %238 = vector.multi_reduction <add>, %237, %cst_80 [1] : vector<16x32xf32> to vector<16xf32>
    %239 = vector.shape_cast %238 : vector<16xf32> to vector<16x1xf32>
    %cst_81 = arith.constant 3.200000e+01 : f32
    %240 = vector.broadcast %cst_81 : f32 to vector<16x1xf32>
    %241 = arith.divf %239, %240 : vector<16x1xf32>
    %242 = vector.broadcast %234 : vector<16x1xf32> to vector<16x32xf32>
    %243 = arith.subf %226, %242 : vector<16x32xf32>
    %cst_82 = arith.constant 9.99999974E-6 : f32
    %244 = vector.broadcast %cst_82 : f32 to vector<16x1xf32>
    %245 = arith.addf %241, %244 : vector<16x1xf32>
    %246 = math.rsqrt %245 : vector<16x1xf32>
    %247 = vector.broadcast %246 : vector<16x1xf32> to vector<16x32xf32>
    %248 = arith.mulf %243, %247 : vector<16x32xf32>
    %249 = vector.broadcast %228 : vector<1x32xf32> to vector<16x32xf32>
    %250 = arith.mulf %248, %249 : vector<16x32xf32>
    %251 = vector.broadcast %230 : vector<1x32xf32> to vector<16x32xf32>
    %252 = arith.addf %250, %251 : vector<16x32xf32>
    %253 = arith.truncf %252 : vector<16x32xf32> to vector<16x32xbf16>
    %c0_83 = arith.constant 0 : index
    %c0_84 = arith.constant 0 : index
    %c0_85 = arith.constant 0 : index
    %254 = vector.load %arg11[%c0_83, %c0_84, %c0_85] : memref<1x32x64xbf16, #tpu.memory_space<vmem>>, vector<1x32x64xbf16>
    %255 = vector.shape_cast %254 : vector<1x32x64xbf16> to vector<32x64xbf16>
    %cst_86 = arith.constant dense<0.000000e+00> : vector<16x64xf32>
    %256 = tpu.matmul %253, %255, %cst_86 {dimension_numbers = #tpu.dot_dimension_numbers<[1], [0], [0], [1], [0, 0, 1, 1], [], []>} : vector<16x32xbf16>, vector<32x64xbf16>, vector<16x64xf32> -> vector<16x64xf32>
    %c0_87 = arith.constant 0 : index
    %c0_88 = arith.constant 0 : index
    %c0_89 = arith.constant 0 : index
    %257 = vector.load %arg12[%c0_87, %c0_88, %c0_89] : memref<1x1x64xf32, #tpu.memory_space<vmem>>, vector<1x1x64xf32>
    %258 = vector.shape_cast %257 : vector<1x1x64xf32> to vector<1x64xf32>
    %259 = vector.broadcast %258 : vector<1x64xf32> to vector<16x64xf32>
    %260 = arith.addf %256, %259 : vector<16x64xf32>
    %261 = arith.truncf %260 : vector<16x64xf32> to vector<16x64xbf16>
    %c0_90 = arith.constant 0 : index
    %c0_91 = arith.constant 0 : index
    %c0_92 = arith.constant 0 : index
    %262 = vector.load %arg13[%c0_90, %c0_91, %c0_92] : memref<1x64x32xbf16, #tpu.memory_space<vmem>>, vector<1x64x32xbf16>
    %263 = vector.shape_cast %262 : vector<1x64x32xbf16> to vector<64x32xbf16>
    %cst_93 = arith.constant dense<0.000000e+00> : vector<16x32xf32>
    %264 = tpu.matmul %261, %263, %cst_93 {dimension_numbers = #tpu.dot_dimension_numbers<[1], [0], [0], [1], [0, 0, 1, 1], [], []>} : vector<16x64xbf16>, vector<64x32xbf16>, vector<16x32xf32> -> vector<16x32xf32>
    %c0_94 = arith.constant 0 : index
    %c0_95 = arith.constant 0 : index
    %c0_96 = arith.constant 0 : index
    %265 = vector.load %arg14[%c0_94, %c0_95, %c0_96] : memref<1x1x32xf32, #tpu.memory_space<vmem>>, vector<1x1x32xf32>
    %266 = vector.shape_cast %265 : vector<1x1x32xf32> to vector<1x32xf32>
    %267 = vector.broadcast %266 : vector<1x32xf32> to vector<16x32xf32>
    %268 = arith.addf %264, %267 : vector<16x32xf32>
    %269 = arith.addf %226, %268 : vector<16x32xf32>
    %c0_97 = arith.constant 0 : index
    %c0_98 = arith.constant 0 : index
    %270 = vector.load %arg15[%c0_97, %c0_98] : memref<16x32xf32, #tpu.memory_space<vmem>>, vector<16x32xf32>
    tpu.vector_store %arg15[%c0_97, %c0_98], %269 {strides = array<i32>} : memref<16x32xf32, #tpu.memory_space<vmem>>, vector<16x32xf32>,
    return
  }
  func.func @transform_0(%arg0: i32, %arg1: i32) -> (i32, i32) {
    %c0_i32 = arith.constant 0 : i32
    %c0_i32_0 = arith.constant 0 : i32
    return %arg0, %c0_i32 : i32, i32
  }
  func.func @transform_1(%arg0: i32, %arg1: i32) -> (i32, i32, i32) {
    %c0_i32 = arith.constant 0 : i32
    %c0_i32_0 = arith.constant 0 : i32
    %c0_i32_1 = arith.constant 0 : i32
    return %arg1, %c0_i32, %c0_i32_0 : i32, i32, i32
  }
  func.func @transform_2(%arg0: i32, %arg1: i32) -> (i32, i32, i32) {
    %c0_i32 = arith.constant 0 : i32
    %c0_i32_0 = arith.constant 0 : i32
    %c0_i32_1 = arith.constant 0 : i32
    return %arg1, %c0_i32, %c0_i32_0 : i32, i32, i32
  }
  func.func @transform_3(%arg0: i32, %arg1: i32) -> (i32, i32, i32) {
    %c0_i32 = arith.constant 0 : i32
    %c0_i32_0 = arith.constant 0 : i32
    %c0_i32_1 = arith.constant 0 : i32
    return %arg1, %c0_i32, %c0_i32_0 : i32, i32, i32
  }
  func.func @transform_4(%arg0: i32, %arg1: i32) -> (i32, i32, i32) {
    %c0_i32 = arith.constant 0 : i32
    %c0_i32_0 = arith.constant 0 : i32
    %c0_i32_1 = arith.constant 0 : i32
    return %arg1, %c0_i32, %c0_i32_0 : i32, i32, i32
  }
  func.func @transform_5(%arg0: i32, %arg1: i32) -> (i32, i32, i32) {
    %c0_i32 = arith.constant 0 : i32
    %c0_i32_0 = arith.constant 0 : i32
    %c0_i32_1 = arith.constant 0 : i32
    return %arg1, %c0_i32, %c0_i32_0 : i32, i32, i32
  }
  func.func @transform_6(%arg0: i32, %arg1: i32) -> (i32, i32, i32) {
    %c0_i32 = arith.constant 0 : i32
    %c0_i32_0 = arith.constant 0 : i32
    %c0_i32_1 = arith.constant 0 : i32
    return %arg1, %c0_i32, %c0_i32_0 : i32, i32, i32
  }
  func.func @transform_7(%arg0: i32, %arg1: i32) -> (i32, i32, i32) {
    %c0_i32 = arith.constant 0 : i32
    %c0_i32_0 = arith.constant 0 : i32
    %c0_i32_1 = arith.constant 0 : i32
    return %arg1, %c0_i32, %c0_i32_0 : i32, i32, i32
  }
  func.func @transform_8(%arg0: i32, %arg1: i32) -> (i32, i32, i32) {
    %c0_i32 = arith.constant 0 : i32
    %c0_i32_0 = arith.constant 0 : i32
    %c0_i32_1 = arith.constant 0 : i32
    return %arg1, %c0_i32, %c0_i32_0 : i32, i32, i32
  }
  func.func @transform_9(%arg0: i32, %arg1: i32) -> (i32, i32, i32) {
    %c0_i32 = arith.constant 0 : i32
    %c0_i32_0 = arith.constant 0 : i32
    %c0_i32_1 = arith.constant 0 : i32
    return %arg1, %c0_i32, %c0_i32_0 : i32, i32, i32
  }
  func.func @transform_10(%arg0: i32, %arg1: i32) -> (i32, i32, i32) {
    %c0_i32 = arith.constant 0 : i32
    %c0_i32_0 = arith.constant 0 : i32
    %c0_i32_1 = arith.constant 0 : i32
    return %arg1, %c0_i32, %c0_i32_0 : i32, i32, i32
  }
  func.func @transform_11(%arg0: i32, %arg1: i32) -> (i32, i32, i32) {
    %c0_i32 = arith.constant 0 : i32
    %c0_i32_0 = arith.constant 0 : i32
    %c0_i32_1 = arith.constant 0 : i32
    return %arg1, %c0_i32, %c0_i32_0 : i32, i32, i32
  }
  func.func @transform_12(%arg0: i32, %arg1: i32) -> (i32, i32, i32) {
    %c0_i32 = arith.constant 0 : i32
    %c0_i32_0 = arith.constant 0 : i32
    %c0_i32_1 = arith.constant 0 : i32
    return %arg1, %c0_i32, %c0_i32_0 : i32, i32, i32
  }
  func.func @transform_13(%arg0: i32, %arg1: i32) -> (i32, i32) {
    %c0_i32 = arith.constant 0 : i32
    %c0_i32_0 = arith.constant 0 : i32
    return %arg0, %c0_i32 : i32, i32
  }
}

</mosaic_0001>

<bundles_post_ra>
// kernel: tpu_custom_call.1
= control target key start
LH: loop header
LB: loop body
LE: loop exit
PB: predicated region body
PF: predicated region fallthrough
CT: control target
= control target key end

     0   :  { %s2727_s0 = inlined_call_operand.hbm [shape: f32[16,32], index: 0, kind: input, shape index: {}]   ;;  %s2728_s1 = inlined_call_operand.hbm [shape: f32[2,1,32], index: 1, kind: input, shape index: {}]   ;;  %s2729_s2 = inlined_call_operand.hbm [shape: f32[2,1,32], index: 2, kind: input, shape index: {}]   ;;  %s2730_s3 = inlined_call_operand.vmem [shape: bf16[2,32,96], index: 3, kind: input, shape index: {}]   ;;  %s2731_s4 = inlined_call_operand.vmem [shape: f32[2,1,96], index: 4, kind: input, shape index: {}]   ;;  %s2732_s5 = inlined_call_operand.vmem [shape: bf16[2,32,32], index: 5, kind: input, shape index: {}]   ;;  %s2733_s6 = inlined_call_operand.vmem [shape: f32[2,1,32], index: 6, kind: input, shape index: {}]   ;;  %s2734_s7 = inlined_call_operand.hbm [shape: f32[2,1,32], index: 7, kind: input, shape index: {}]   ;;  %s2735_s8 = inlined_call_operand.vmem [shape: f32[2,1,32], index: 8, kind: input, shape index: {}]   ;;  %s2736_s9 = inlined_call_operand.vmem [shape: bf16[2,32,64], index: 9, kind: input, shape index: {}]   ;;  %s2737_s10 = inlined_call_operand.vmem [shape: f32[2,1,64], index: 10, kind: input, shape index: {}]   ;;  %s2738_s11 = inlined_call_operand.vmem [shape: bf16[2,64,32], index: 11, kind: input, shape index: {}]   ;;  %s2739_s12 = inlined_call_operand.vmem [shape: f32[2,1,32], index: 12, kind: input, shape index: {}]   ;;  %s2740_s13 = inlined_call_operand.hbm [shape: f32[16,32], index: 13, kind: output, shape index: {}]  }
   0x1   :  { %2745 = sst [smem:[#allocation20_spill]] %s2727_s0 }
   0x2   :  { %2746 = sst [smem:[#allocation21_spill]] %s2728_s1 }
   0x3   :  { %2747 = sst [smem:[#allocation22_spill]] %s2729_s2 }
   0x4   :  { %2748 = sst [smem:[#allocation23_spill]] %s2730_s3 }
   0x5   :  { %2749 = sst [smem:[#allocation24_spill]] %s2732_s5 }
   0x6   :  { %2750 = sst [smem:[#allocation25_spill]] %s2734_s7 }
   0x7   :  { %2751 = sst [smem:[#allocation26_spill]] %s2736_s9 }
   0x8   :  { %2752 = sst [smem:[#allocation27_spill]] %s2737_s10 }
   0x9   :  { %2753 = sst [smem:[#allocation28_spill]] %s2738_s11 }
   0xa   :  { %2754 = sst [smem:[#allocation29_spill]] %s2739_s12 }
   0xb   :  { %2755 = sst [smem:[#allocation30_spill]] %s2740_s13 }
   0xc   :  { %18 = vsyncpa [#allocation3], 0 }
   0xd   :  { %19 = vsyncpa [#allocation6], 0 }
   0xe   :  { %21 = vsyncpa [#allocation6 + $0x1], 0 }
   0xf   :  { %22 = vsyncpa [#allocation9], 0 }
  0x10   :  { %24 = vsyncpa [#allocation9 + $0x1], 0 }
  0x11   :  { %25 = vsyncpa [#allocation4], 0  ;;  %s2344_s25 = smov 0   ;;  %s2346_s26 = smov 0  }
  0x12   :  { %s2348_s27 = smov 0   ;;  %s2350_s28 = smov 0  }
  0x13   :  { %s2352_s29 = smov 0   ;;  %s2354_s30 = smov 0  }
  0x14 LB: > { %2756 = sst [smem:[#allocation15_spill]] %s2242_s27  ;;  %s40_s14 = sadd.s32 1, %s2250_s29  ;;  %s2254_s30 = sphi %s2354_s30, %s31_s30   ;;  %s2250_s29 = sphi %s2352_s29, %s2787_s29   ;;  %s2246_s28 = sphi %s2350_s28, %s2786_s28   ;;  %s2242_s27 = sphi %s2348_s27, %s2785_s27   ;;  %s2238_s26 = sphi %s2346_s26, %s2789_s26   ;;  %s2234_s25 = sphi %s2344_s25, %s2788_s25  }
  0x15   : > { %2757 = sst [smem:[#allocation16_spill]] %s2250_s29  ;;  %s76_s15 = sadd.s32 1, %s2242_s27 }
  0x16   : > { %2758 = sst [smem:[#allocation17_spill]] %s2254_s30  ;;  %p41_p0 = scmp.ge.s32.totalorder %s40_s14, 2 }
  0x17   : > { %p83_p1 = scmp.ne.s32.totalorder %s2242_s27, %s2238_s26  ;;  %p84_p2 = scmp.eq.s32.totalorder %s2254_s30, 0 }
  0x18   : > { %p89_p3 = scmp.ne.s32.totalorder %s2238_s26, %s2234_s25  ;;  %s2791_s14 = smov (%p41_p0, %s40_s14), 0 }
  0x19   : > { %2759 = sst [smem:[#allocation18_spill]] %s2791_s14  ;;  %p2383_p4 = por %p84_p2, %p83_p1 }
  0x1a   : > { %s73_s17 = ssub.s32 %s2250_s29, %s2791_s14  ;;  %p1924_p5 = scmp.lt.s32.totalorder %s2254_s30, 2 }
  0x1b   : > { %p74_p6 = scmp.eq.s32.totalorder %s73_s17, 0  ;;  %s442_s18 = sand.u32 1, %s2254_s30  }
  0x1c   : > { %s2392_s19 = sand.u32 1, %s2242_s27   ;;  %s2762_s1 = sld [smem:[#allocation21_spill]] }
  0x1d   : > { %s2395_s20 = scalar_select %p74_p6, %s2242_s27, %s76_s15  }
  0x1e   : > { %s445_s13 = scalar_lea.vmem [#allocation5], %s2392_s19  ;;  %p2404_p7 = pnand %p1924_p5, %p2383_p4 }
  0x1f   : > { %2761 = sst [smem:[#allocation19_spill]] %s2395_s20  ;;  %s452_s11 = sshll.u32 %s445_s13, 4  ;;  %s453_s11 = int_to_ptr.vmem [resolvable:$true] %s452_s11 }
  0x20   : > { %s2409_s14 = sadd.s32 4294967295, %s2254_s30   ;;  %s443_s15 = scalar_lea.sflag [#allocation6], %s442_s18 }
  0x21   : > { %p90_p8 = scmp.eq.s32.totalorder %s2409_s14, 0  ;;  %p1806_p10 = scmp.ge.s32.totalorder %s2254_s30, 1 }
  0x22   : > { %s448_s23 = scalar_lea.hbm %s2762_s1, %s2250_s29  ;;  %p412_p11 = scmp.lt.s32.totalorder %s2254_s30, 3 }
  0x23   : > { %s450_s24 = sshll.u32 %s448_s23, 4  ;;  %p2419_p9 = por %p90_p8, %p89_p3  ;;  %s451_s24 = int_to_ptr.hbm [resolvable:$true] %s450_s24 }
  0x24   : > { %1916 = dma.hbm_to_vmem [thread:$0]  (!%p2404_p7), %s451_s24, 16, %s453_s11, %s443_s15  }
  0x25   : > { %s2765_s0 = sld [smem:[#allocation20_spill]]  ;;  %p2428_p12 = pnand %p1806_p10, %p412_p11 }
  0x26   : > { %s2256_s11 = smov [#allocation2]   ;;  %s2767_s2 = sld [smem:[#allocation22_spill]] }
  0x27   : > { %s428_s25 = sshll.u32 %s2256_s11, 4  ;;  %p1909_p13 = pneg %p2428_p12  ;;  %s429_s25 = int_to_ptr.vmem [resolvable:$true] %s428_s25 }
  0x28   : > { %s2257_s20 = smov 128   ;;  %s2258_s27 = smov 8  }
  0x29   : > { %p1910_p0 = pnand %p1909_p13, %p90_p8  ;;  %s2768_s7 = sld [smem:[#allocation25_spill]] }
  0x2a   : > { %s507_s9 = scalar_lea.vmem [#allocation8], %s2392_s19  ;;  %s505_s24 = scalar_lea.sflag [#allocation9], %s2392_s19 }
  0x2b   : > { %s426_s22 = sshll.u32 %s2765_s0, 4  ;;  %s462_s0 = scalar_lea.vmem [#allocation7], %s2392_s19  ;;  %s427_s22 = int_to_ptr.hbm [resolvable:$true] %s426_s22 }
  0x2c   : > { %s465_s16 = scalar_lea.hbm %s2767_s2, %s2250_s29  ;;  %s469_s1 = sshll.u32 %s462_s0, 4  ;;  %s470_s1 = int_to_ptr.vmem [resolvable:$true] %s469_s1 }
  0x2d   : > { %s467_s21 = sshll.u32 %s465_s16, 4  ;;  %s514_s18 = sshll.u32 %s507_s9, 4  ;;  %s468_s21 = int_to_ptr.hbm [resolvable:$true] %s467_s21  ;;  %s515_s18 = int_to_ptr.vmem [resolvable:$true] %s514_s18 }
  0x2e   : > { %1912 = dma.hbm_to_vmem [thread:$0]  (!%p1910_p0), %s427_s22, 256, %s429_s25, [#allocation3], %s2257_s20, %s2257_s20, %s2258_s27  }
  0x2f   : > { %1919 = dma.hbm_to_vmem [thread:$0]  (!%p2404_p7), %s468_s21, 16, %s470_s1, %s443_s15  }
  0x30   : > { %s510_s12 = scalar_lea.hbm %s2768_s7, %s2250_s29  ;;  %557 = sbr.rel (%p2428_p12) target bundleno = 2543 (0x9ef), region = 72 }
  0x31   : > { %s512_s10 = sshll.u32 %s510_s12, 4  ;;  %s513_s10 = int_to_ptr.hbm [resolvable:$true] %s512_s10 }
  0x32   : > { %1922 = dma.hbm_to_vmem [thread:$0]  (!%p2404_p7), %s513_s10, 16, %s515_s18, %s505_s24  }
  0x35   : > { %2217 = dma.done.wait (%p90_p8), [#allocation3], 256  }
  0x36   : > { %2219 = vsyncadd (%p90_p8), [#allocation3], 4294967040  ;;  %s564_s0 = sand.u32 1, %s2409_s14   ;;  %s2459_s1 = sand.u32 1, %s2238_s26  }
  0x37   : > { %s565_s9 = scalar_lea.sflag [#allocation6], %s564_s0 }
  0x38   : > { %2221 = dma.done.wait (%p2419_p9), %s565_s9, 32  }
  0x39   : > { %2223 = vsyncadd (%p2419_p9), %s565_s9, 4294967264  ;;  %s583_s27 = scalar_lea.sflag [#allocation9], %s2459_s1 }
  0x3a   : > { %2225 = dma.done.wait (%p2419_p9), %s583_s27, 16  }
  0x3b   : > { %2227 = vsyncadd (%p2419_p9), %s583_s27, 4294967280  ;;  %p667_p1 = scmp.lt.s32.totalorder %s2246_s28, 1  ;;  %s2769_s3 = sld [smem:[#allocation23_spill]] }
  0x3c   : > { %s2770_s5 = sld [smem:[#allocation24_spill]]  ;;  %p1819_p2 = scmp.ne.s32.totalorder %s2246_s28, 0 }
  0x3d   : > { %s2475_s19 = scalar_select %p667_p1, %s2246_s28, 1 }
  0x3e   : > { %s2771_s22 = sld [smem:[#allocation26_spill]] }
  0x3f   : > { %s1883_s20 = sshll.u32 %s2475_s19, 4  ;;  %s685_s30 = scalar_lea.vmem %s2735_s8, %s2475_s19 }
  0x40   : > { %s2772_s12 = sld [smem:[#allocation27_spill]]  ;;  %s1886_s16 = sshll.u32 %s2475_s19, 5 }
  0x41   : > { %s2485_s25 = scalar_lea.vmem %s2769_s3, %s1883_s20  ;;  %s2774_s0 = sld [smem:[#allocation28_spill]] }
  0x42   : > { %s2490_s11 = scalar_lea.vmem %s2770_s5, %s1883_s20  ;;  %s2773_s5 = sld [smem:[#allocation29_spill]] }
  0x44   : > { %s2503_s10 = scalar_lea.vmem %s2771_s22, %s1883_s20  ;;  %707 = sbr.rel (%p1819_p2) target bundleno = 76 (0x4c), region = 92 }
  0x46   : > { %s693_s2 = scalar_lea.vmem %s2772_s12, %s2475_s19 }
  0x47   : > { %s2517_s29 = scalar_lea.vmem %s2774_s0, %s1886_s16 }
  0x48   : > { %s701_s7 = scalar_lea.vmem %s2773_s5, %s2475_s19 }
  0x49   : > { %v708_v0 = vld [vmem:[#allocation2] sm:$0xff]  ;;  %vm710_vm0 = vcmask 261120   ;;  %v709_v1 = vld [vmem:[#allocation2 + $0x8] sm:$0xff] }
  0x4a   : > { %711 = vst.msk [vmem:[#allocation10] sm:$0xff] %vm710_vm0, %v708_v0 }
  0x4b   : > { %712 = vst.msk [vmem:[#allocation10 + $0x8] sm:$0xff] %vm710_vm0, %v709_v1 }
  0x4c PF: > { %vm717_vm1 = vcmask 261120   ;;  %v2259_v6 = vmov 32.0   ;;  %v1888_v23 = vld [vmem:[%s2485_s25 + $0x8] sm:$0xff]  ;;  %v1887_v25 = vld [vmem:[%s2485_s25] sm:$0xff]  ;;  %s2775_s3 = scalar_lea.vmem [#allocation5], %s2459_s1  ;;  %s2776_s5 = scalar_lea.vmem [#allocation7], %s2459_s1 }
  0x4d   : > { %2002 = vrcp.f32 %v2259_v6  ;;  %809 = vmatpush.bf16.msra.mxu0 %v1888_v23  ;;  %v1994_v44 = vld [vmem:[%s2775_s3] ss:$0 sm:$0xff]  ;;  %s2777_s20 = scalar_lea.vmem %s2731_s4, %s2475_s19  ;;  %s2260_s22 = smov 64   ;;  %vm829_vm9 = vcmask 64512   ;;  %vm864_vm10 = vcmask 1043456  }
  0x4e   : > { %v1995_v49 = vld [vmem:[%s2776_s5] ss:$0 sm:$0xff]  ;;  %s2261_s25 = smov 96   ;;  %s2262_s0 = smov 88  }
  0x4f   : > { %v1996_v54 = vld [vmem:[%s2777_s20] ss:$0 sm:$0xff]  ;;  %s2263_s9 = smov 120   ;;  %s2264_s27 = smov 80  }
  0x50   : > { %s2265_s17 = smov 112   ;;  %s2266_s15 = smov 56  }
  0x51   : > { %v2520_v2 = vld [vmem:[#allocation10] sm:$0xff]  ;;  %810 = vmatpush.bf16.msra.mxu0 %v1887_v25  ;;  %s2267_s23 = smov 48   ;;  %s2268_s13 = smov 104  }
  0x52   : > { %v718_v3 = vsel %vm717_vm1, %v2520_v2, 0.0  ;;  %v2524_v4 = vld [vmem:[#allocation10 + $0x8] sm:$0xff]  ;;  %s2269_s16 = smov 40   ;;  %s2270_s21 = smov 72  }
  0x53   : > { %719 = vadd.xlane.f32.xlu0 %v718_v3  ;;  %v721_v5 = vsel %vm717_vm1, %v2524_v4, 0.0  ;;  %v2003_v7 = vpop.eup %2002  ;;  %s2778_s24 = scalar_lea.vmem %s2733_s6, %s2475_s19  ;;  %p1926_p3 = scmp.eq.s32.totalorder %s2409_s14, 1 }
  0x54   : > { %v725_v8 = vmul.f32 32.0, %v2003_v7  ;;  %vm729_vm2 = vweird.f32 %v2003_v7  ;;  %s2273_s19 = smov 8  }
  0x56   : > { %v726_v9 = vsub.f32 1.0, %v725_v8 }
  0x58   : > { %v727_v10 = vmul.f32 %v2003_v7, %v726_v9 }
  0x5a   : > { %v728_v11 = vadd.f32 %v2003_v7, %v727_v10 }
  0x5b   : > { %722 = vadd.xlane.f32.xlu0 %v721_v5 }
  0x5c   : > { %v2528_v12 = vsel %vm729_vm2, %v2003_v7, %v728_v11  ;;  %vm1570_vm2 = vcmask 523264  }
  0xc6   : > { %v720_v13 = vpop.xlane.xlu0 %719 }
  0xc7   : > { %v731_v14 = vmul.f32 %v2528_v12, %v720_v13 }
  0xc9   : > { %v733_v15 = vsub.f32 %v2520_v2, %v731_v14 }
  0xcb   : > { %v735_v16 = vmul.f32 %v733_v15, %v733_v15 }
  0xcd   : > { %v737_v17 = vsel %vm717_vm1, %v735_v16, 0.0 }
  0xce   : > { %738 = vadd.xlane.f32.xlu1 %v737_v17  ;;  %v723_v18 = vpop.xlane.xlu0 %722 }
  0xcf   : > { %v732_v19 = vmul.f32 %v2528_v12, %v723_v18 }
  0xd1   : > { %v734_v20 = vsub.f32 %v2524_v4, %v732_v19 }
  0xd3   : > { %v736_v21 = vmul.f32 %v734_v20, %v734_v20 }
  0xd5   : > { %v740_v22 = vsel %vm717_vm1, %v736_v21, 0.0 }
  0xd6   : > { %741 = vadd.xlane.f32.xlu1 %v740_v22 }
 0x141   : > { %v739_v24 = vpop.xlane.xlu1 %738 }
 0x142   : > { %v743_v26 = vmul.f32 %v739_v24, %v2528_v12 }
 0x144   : > { %v745_v27 = vadd.f32 1e-05, %v743_v26 }
 0x146   : > { %2004 = vrsqrt.f32 %v745_v27  ;;  %vm753_vm4 = vweird.f32 %v745_v27 }
 0x149   : > { %v742_v28 = vpop.xlane.xlu1 %741 }
 0x14a   : > { %v744_v29 = vmul.f32 %v742_v28, %v2528_v12 }
 0x14c   : > { %v2005_v30 = vpop.eup %2004  ;;  %v746_v31 = vadd.f32 1e-05, %v744_v29 }
 0x14d   : > { %v748_v32 = vmul.f32 %v2005_v30, %v745_v27  ;;  %vm754_vm3 = vweird.f32 %v2005_v30 }
 0x14e   : > { %2006 = vrsqrt.f32 %v746_v31  ;;  %vm755_vm5 = vmor %vm753_vm4, %vm754_vm3  ;;  %vm763_vm7 = vweird.f32 %v746_v31 }
 0x14f   : > { %v749_v33 = vmul.f32 %v2005_v30, %v748_v32 }
 0x151   : > { %v750_v34 = vmul.f32 0.5, %v749_v33 }
 0x153   : > { %v751_v35 = vsub.f32 1.5, %v750_v34 }
 0x154   : > { %v2007_v36 = vpop.eup %2006 }
 0x155   : > { %v752_v37 = vmul.f32 %v2005_v30, %v751_v35  ;;  %v758_v38 = vmul.f32 %v2007_v36, %v746_v31  ;;  %vm764_vm6 = vweird.f32 %v2007_v36 }
 0x156   : > { %vm765_vm8 = vmor %vm763_vm7, %vm764_vm6 }
 0x157   : > { %v759_v39 = vmul.f32 %v2007_v36, %v758_v38  ;;  %v756_v40 = vsel %vm755_vm5, %v2005_v30, %v752_v37 }
 0x158   : > { %v767_v43 = vmul.f32 %v756_v40, %v733_v15 }
 0x159   : > { %v760_v41 = vmul.f32 0.5, %v759_v39 }
 0x15a   : > { %v772_v48 = vmul.f32 %v1994_v44, %v767_v43 }
 0x15b   : > { %v761_v42 = vsub.f32 1.5, %v760_v41 }
 0x15c   : > { %v777_v51 = vadd.f32 %v1995_v49, %v772_v48 }
 0x15d   : > { %v762_v45 = vmul.f32 %v2007_v36, %v761_v42  ;;  %v819_v42 = vld [vmem:[%s2490_s11] sm:$0xf] }
 0x15e   : > { %v1022_v43 = vsel %vm864_vm10, %v819_v42, 0 }
 0x15f   : > { %v766_v46 = vsel %vm765_vm8, %v2007_v36, %v762_v45 }
 0x160   : > { %v768_v47 = vmul.f32 %v766_v46, %v734_v20 }
 0x162   : > { %v773_v50 = vmul.f32 %v1994_v44, %v768_v47 }
 0x164   : > { %v778_v52 = vadd.f32 %v1995_v49, %v773_v50 }
 0x166   : > { %v779_v53 = vpack.c.bf16 %v778_v52, %v777_v51 }
 0x168   : > { %1828 = vmatmul.msk.bf16.vlgmr.msra.gmra.mxu0 %vm717_vm1, %v779_v53 }
 0x1e5   : > { %v812_v55 = vpop.f32.mrf.mxu0 }
 0x1e6   : > { %v813_v56 = vadd.f32 %v1996_v54, %v812_v55 }
 0x1e8   : > { %v817_v57 = vpack.c.bf16 %v813_v56, %v813_v56 }
 0x1ea   : > { %v825_v58 = vunpack.c.l.b16 %v817_v57 }
 0x1ec   : > { %v2550_v59 = vpack.c.b16 %v825_v58, %v825_v58 }
 0x1ed   : > { %v814_v60 = vpop.f32.mrf.mxu0 }
 0x1ee   : > { %v815_v61 = vadd.f32 %v1996_v54, %v814_v60  ;;  %859 = vrot.lane.b32.xlu1 %v2550_v59, %s2260_s22  ;;  %827 = vrot.lane.b32.xlu2 %v2550_v59, %s2261_s25 }
 0x1f0   : > { %v818_v62 = vpack.c.bf16 %v815_v61, %v815_v61 }
 0x1f2   : > { %v885_v63 = vunpack.c.l.b16 %v818_v62 }
 0x1f4   : > { %v2554_v0 = vpack.c.b16 %v885_v63, %v885_v63 }
 0x1f6   : > { %887 = vrot.lane.b32.xlu2 %v2554_v0, %s2261_s25 }
 0x248   : > { %v828_v1 = vpop.permute.xlu2 %827 }
 0x249   : > { %v834_v3 = vsel %vm829_vm9, %v828_v1, 0 }
 0x24a   : > { %843 = vmatpush.bf16.xpose.msra.mxu1 %v834_v3 }
 0x250   : > { %v888_v5 = vpop.permute.xlu2 %887 }
 0x251   : > { %1829 = vmatmul.msk.bf16.vlgmr.msra.gmra.mxu1 %vm829_vm9, %v817_v57  ;;  %v893_v6 = vsel %vm829_vm9, %v888_v5, 0 }
 0x252   : > { %902 = vmatpush.bf16.xpose.msra.mxu3 %v893_v6 }
 0x259   : > { %1831 = vmatmul.msk.bf16.vlgmr.msra.gmra.mxu3 %vm829_vm9, %v818_v62 }
 0x260   : > { %v860_v7 = vpop.permute.xlu1 %859 }
 0x261   : > { %v866_v8 = vsel %vm864_vm10, %v860_v7, 0 }
 0x262   : > { %875 = vmatpush.bf16.msra.mxu2 %v866_v8 }
 0x2ce   : > { %v845_v9 = vpop.f32.mrf.mxu1 }
 0x2cf   : > { %v849_v10 = vsel %vm829_vm9, %v845_v9, -inf }
 0x2d0   : > { %850 = vmax.xlane.f32.xlu0 %v849_v10 }
 0x2d6   : > { %v847_v11 = vpop.f32.mrf.mxu1 }
 0x2dc   : > { %v904_v13 = vpop.f32.mrf.mxu3 }
 0x2dd   : > { %v908_v14 = vsel %vm829_vm9, %v904_v13, -inf }
 0x2de   : > { %909 = vmax.xlane.f32.xlu2 %v908_v14 }
 0x2e4   : > { %918 = vrot.lane.b32.xlu0 %v2554_v0, %s2260_s22  ;;  %v906_v15 = vpop.f32.mrf.mxu3 }
 0x2ec   : > { %944 = vrot.lane.b32.xlu0 %v2550_v59, %s2262_s0 }
 0x2f6   : > { %942 = vrot.lane.b32.xlu2 %v2550_v59, %s2263_s9 }
 0x2fe   : > { %1039 = vrot.lane.b32.xlu2 %v2554_v0, %s2262_s0 }
 0x306   : > { %1205 = vrot.lane.b32.xlu2 %v2554_v0, %s2264_s27 }
 0x30e   : > { %1203 = vrot.lane.b32.xlu2 %v2554_v0, %s2265_s17 }
 0x316   : > { %1126 = vrot.lane.b32.xlu2 %v2550_v59, %s2265_s17 }
 0x31e   : > { %975 = vrot.lane.b32.xlu2 %v2550_v59, %s2266_s15 }
 0x326   : > { %1070 = vrot.lane.b32.xlu2 %v2554_v0, %s2266_s15 }
 0x343   : > { %v851_v16 = vpop.xlane.xlu0 %850 }
 0x344   : > { %v852_v17 = vsub.f32 %v845_v9, %v851_v16 }
 0x346   : > { %v853_v18 = vmul.f32 1.442695, %v852_v17 }
 0x348   : > { %2008 = vpow2.f32 %v853_v18 }
 0x34e   : > { %v2009_v19 = vpop.eup %2008 }
 0x34f   : > { %v855_v20 = vsel %vm829_vm9, %v2009_v19, 0.0  ;;  %v858_v21 = vpack.c.bf16 %v2009_v19, %v2009_v19 }
 0x350   : > { %856 = vadd.xlane.f32.xlu1 %v855_v20 }
 0x351   : > { %1830 = vmatmul.msk.bf16.vlgmr.msra.gmra.mxu2 %vm829_vm9, %v858_v21  ;;  %v910_v22 = vpop.xlane.xlu2 %909 }
 0x352   : > { %v911_v23 = vsub.f32 %v904_v13, %v910_v22 }
 0x354   : > { %v912_v24 = vmul.f32 1.442695, %v911_v23 }
 0x356   : > { %2010 = vpow2.f32 %v912_v24  ;;  %v919_v25 = vpop.permute.xlu0 %918 }
 0x357   : > { %v924_v26 = vsel %vm864_vm10, %v919_v25, 0  ;;  %v820_v25 = vld [vmem:[%s2490_s11 + $0x4] sm:$0xf] }
 0x358   : > { %933 = vmatpush.bf16.msrb.mxu2 %v924_v26  ;;  %v1003_v26 = vsel %vm864_vm10, %v820_v25, 0 }
 0x359   : > { %v943_v27 = vpop.permute.xlu2 %942  ;;  %1012 = vmatpush.bf16.msrb.mxu3 %v1003_v26 }
 0x35c   : > { %v2011_v28 = vpop.eup %2010  ;;  %1031 = vmatpush.bf16.msra.mxu2 %v1022_v43 }
 0x35d   : > { %v914_v29 = vsel %vm829_vm9, %v2011_v28, 0.0  ;;  %v917_v32 = vpack.c.bf16 %v2011_v28, %v2011_v28  ;;  %1104 = vmatpush.bf16.msra.mxu3 %v1003_v26 }
 0x35e   : > { %v945_v30 = vpop.permute.xlu0 %944  ;;  %915 = vadd.xlane.f32.xlu0 %v914_v29 }
 0x35f   : > { %v950_v31 = vsel %vm829_vm9, %v945_v30, 0 }
 0x360   : > { %959 = vmatpush.bf16.xpose.msrb.mxu0 %v950_v31 }
 0x361   : > { %1832 = vmatmul.msk.bf16.vlgmr.msrb.gmra.mxu2 %vm829_vm9, %v917_v32  ;;  %v1040_v33 = vpop.permute.xlu2 %1039 }
 0x362   : > { %v1045_v34 = vsel %vm829_vm9, %v1040_v33, 0  ;;  %1120 = vmatpush.bf16.msrb.mxu2 %v1022_v43 }
 0x367   : > { %1833 = vmatmul.msk.bf16.vlgmr.msrb.gmra.mxu0 %vm829_vm9, %v943_v27 }
 0x368   : > { %1054 = vmatpush.bf16.xpose.msra.mxu0 %v1045_v34 }
 0x369   : > { %1037 = vrot.lane.b32.xlu1 %v2554_v0, %s2263_s9  ;;  %v1206_v35 = vpop.permute.xlu2 %1205  ;;  %s2782_s9 = sld [smem:[#allocation30_spill]] }
 0x36a   : > { %v1211_v49 = vsel %vm829_vm9, %v1206_v35, 0 }
 0x371   : > { %v1204_v36 = vpop.permute.xlu2 %1203 }
 0x372   : > { %1128 = vrot.lane.b32.xlu0 %v2550_v59, %s2264_s27  ;;  %s1602_s27 = sshll.u32 %s2782_s9, 4  ;;  %s1603_s27 = int_to_ptr.hbm [resolvable:$true] %s1602_s27 }
 0x379   : > { %v1127_v37 = vpop.permute.xlu2 %1126 }
 0x381   : > { %v976_v38 = vpop.permute.xlu2 %975 }
 0x382   : > { %v981_v39 = vsel %vm864_vm10, %v976_v38, 0 }
 0x383   : > { %990 = vmatpush.bf16.msrb.mxu1 %v981_v39 }
 0x389   : > { %v1071_v40 = vpop.permute.xlu2 %1070 }
 0x38a   : > { %v1076_v41 = vsel %vm864_vm10, %v1071_v40, 0 }
 0x38b   : > { %1085 = vmatpush.bf16.msra.mxu1 %v1076_v41 }
 0x3c3   : > { %v857_v44 = vpop.xlane.xlu1 %856 }
 0x3c4   : > { %2012 = vrcp.f32 %v857_v44 }
 0x3ca   : > { %v2013_v45 = vpop.eup %2012 }
 0x3d1   : > { %v916_v50 = vpop.xlane.xlu0 %915 }
 0x3d2   : > { %2014 = vrcp.f32 %v916_v50 }
 0x3d4   : > { %v877_v46 = vpop.f32.mrf.mxu2 }
 0x3d5   : > { %v882_v47 = vmul.f32 %v2013_v45, %v877_v46 }
 0x3d7   : > { %v883_v48 = vpack.c.bf16 %v882_v47, %v882_v47 }
 0x3d8   : > { %v2015_v53 = vpop.eup %2014 }
 0x3d9   : > { %1836 = vmatmul.msk.bf16.vlgmr.msra.gmra.mxu2 %vm829_vm9, %v883_v48 }
 0x3da   : > { %1220 = vmatpush.bf16.xpose.msra.mxu2 %v1211_v49 }
 0x3db   : > { %v1038_v51 = vpop.permute.xlu1 %1037 }
 0x3dc   : > { %v879_v52 = vpop.f32.mrf.mxu2  ;;  %1837 = vmatmul.msk.bf16.vlgmr.msra.gmra.mxu0 %vm829_vm9, %v1038_v51 }
 0x3e4   : > { %v935_v54 = vpop.f32.mrf.mxu2  ;;  %v1129_v55 = vpop.permute.xlu0 %1128 }
 0x3e5   : > { %v940_v56 = vmul.f32 %v2015_v53, %v935_v54  ;;  %v1134_v57 = vsel %vm829_vm9, %v1129_v55, 0  ;;  %v961_v58 = vpop.f32.mrf.mxu0  ;;  %v821_v53 = vld [vmem:[%s2490_s11 + $0x8] sm:$0xf] }
 0x3e6   : > { %v965_v60 = vsel %vm829_vm9, %v961_v58, -inf  ;;  %1143 = vmatpush.bf16.xpose.msrb.mxu0 %v1134_v57  ;;  %v1187_v54 = vsel %vm864_vm10, %v821_v53, 0 }
 0x3e7   : > { %v941_v61 = vpack.c.bf16 %v940_v56, %v940_v56  ;;  %966 = vmax.xlane.f32.xlu1 %v965_v60 }
 0x3e9   : > { %1840 = vmatmul.msk.bf16.vlgmr.msrb.gmra.mxu2 %vm829_vm9, %v941_v61 }
 0x3ec   : > { %v937_v62 = vpop.f32.mrf.mxu2 }
 0x3ed   : > { %v963_v63 = vpop.f32.mrf.mxu0  ;;  %1841 = vmatmul.msk.bf16.vlgmr.msrb.gmra.mxu0 %vm829_vm9, %v1127_v37 }
 0x3f9   : > { %1844 = vmatmul.msk.bf16.vlgmr.msra.gmra.mxu2 %vm829_vm9, %v1204_v36 }
 0x459   : > { %v1056_v1 = vpop.f32.mrf.mxu0 }
 0x45a   : > { %v967_v3 = vpop.xlane.xlu1 %966  ;;  %v1060_v5 = vsel %vm829_vm9, %v1056_v1, -inf }
 0x45b   : > { %v968_v6 = vsub.f32 %v961_v58, %v967_v3  ;;  %1061 = vmax.xlane.f32.xlu0 %v1060_v5 }
 0x45c   : > { %v2600_v7 = vpop.f32.mrf.mxu2 }
 0x45d   : > { %v969_v8 = vmul.f32 1.442695, %v968_v6 }
 0x45f   : > { %2016 = vpow2.f32 %v969_v8 }
 0x461   : > { %v1058_v9 = vpop.f32.mrf.mxu0 }
 0x464   : > { %v1035_v10 = vpop.f32.mrf.mxu2 }
 0x465   : > { %v2017_v11 = vpop.eup %2016 }
 0x466   : > { %v974_v13 = vpack.c.bf16 %v2017_v11, %v2017_v11  ;;  %v971_v18 = vsel %vm829_vm9, %v2017_v11, 0.0 }
 0x468   : > { %1834 = vmatmul.msk.bf16.vlgmr.msrb.gmra.mxu1 %vm829_vm9, %v974_v13 }
 0x46a   : > { %v1145_v14 = vpop.f32.mrf.mxu0 }
 0x46b   : > { %v1149_v15 = vsel %vm829_vm9, %v1145_v14, -inf }
 0x46c   : > { %v2604_v16 = vpop.f32.mrf.mxu2  ;;  %1150 = vmax.xlane.f32.xlu2 %v1149_v15 }
 0x46f   : > { %1159 = vrot.lane.b32.xlu0 %v2550_v59, %s2267_s23 }
 0x472   : > { %v1147_v17 = vpop.f32.mrf.mxu0 }
 0x474   : > { %v1124_v19 = vpop.f32.mrf.mxu2  ;;  %972 = vadd.xlane.f32.xlu2 %v971_v18 }
 0x47c   : > { %v1222_v20 = vpop.f32.mrf.mxu2 }
 0x47d   : > { %v1226_v21 = vsel %vm829_vm9, %v1222_v20, -inf }
 0x47e   : > { %1227 = vmax.xlane.f32.xlu1 %v1226_v21 }
 0x484   : > { %v1224_v22 = vpop.f32.mrf.mxu2 }
 0x497   : > { %1236 = vrot.lane.b32.xlu1 %v2554_v0, %s2267_s23 }
 0x4ce   : > { %v1062_v23 = vpop.xlane.xlu0 %1061 }
 0x4cf   : > { %v1063_v24 = vsub.f32 %v1056_v1, %v1062_v23 }
 0x4d1   : > { %v1064_v27 = vmul.f32 1.442695, %v1063_v24 }
 0x4d3   : > { %2018 = vpow2.f32 %v1064_v27 }
 0x4d9   : > { %v2019_v28 = vpop.eup %2018 }
 0x4da   : > { %v1069_v29 = vpack.c.bf16 %v2019_v28, %v2019_v28  ;;  %v1066_v30 = vsel %vm829_vm9, %v2019_v28, 0.0 }
 0x4db   : > { %1067 = vadd.xlane.f32.xlu0 %v1066_v30 }
 0x4dc   : > { %1838 = vmatmul.msk.bf16.vlgmr.msra.gmra.mxu1 %vm829_vm9, %v1069_v29 }
 0x4df   : > { %v1151_v31 = vpop.xlane.xlu2 %1150 }
 0x4e0   : > { %v1152_v32 = vsub.f32 %v1145_v14, %v1151_v31 }
 0x4e1   : > { %v1160_v33 = vpop.permute.xlu0 %1159 }
 0x4e2   : > { %v1153_v34 = vmul.f32 1.442695, %v1152_v32  ;;  %v1165_v35 = vsel %vm864_vm10, %v1160_v33, 0 }
 0x4e3   : > { %1174 = vmatpush.bf16.msrb.mxu1 %v1165_v35 }
 0x4e4   : > { %2020 = vpow2.f32 %v1153_v34 }
 0x4e5   : > { %v992_v36 = vpop.f32.mrf.mxu1 }
 0x4e7   : > { %v973_v37 = vpop.xlane.xlu2 %972  ;;  %1270 = vmatpush.bf16.msra.mxu1 %v1187_v54 }
 0x4e8   : > { %2022 = vrcp.f32 %v973_v37 }
 0x4ea   : > { %v2021_v38 = vpop.eup %2020 }
 0x4eb   : > { %v1158_v39 = vpack.c.bf16 %v2021_v38, %v2021_v38  ;;  %v1155_v40 = vsel %vm829_vm9, %v2021_v38, 0.0 }
 0x4ec   : > { %1156 = vadd.xlane.f32.xlu2 %v1155_v40 }
 0x4ed   : > { %v994_v41 = vpop.f32.mrf.mxu1  ;;  %1842 = vmatmul.msk.bf16.vlgmr.msrb.gmra.mxu1 %vm829_vm9, %v1158_v39 }
 0x4ee   : > { %v2023_v42 = vpop.eup %2022 }
 0x4ef   : > { %v997_v43 = vmul.f32 %v2023_v42, %v992_v36  ;;  %1277 = vrot.lane.b32.xlu0 %v2550_v59, %s2268_s13 }
 0x4f1   : > { %v1228_v44 = vpop.xlane.xlu1 %1227  ;;  %v998_v45 = vpack.c.bf16 %v997_v43, %v997_v43 }
 0x4f2   : > { %v1229_v46 = vsub.f32 %v1222_v20, %v1228_v44 }
 0x4f3   : > { %1835 = vmatmul.msk.bf16.vlgmr.msrb.gmra.mxu3 %vm829_vm9, %v998_v45 }
 0x4f4   : > { %v1230_v47 = vmul.f32 1.442695, %v1229_v46  ;;  %1196 = vmatpush.bf16.msrb.mxu3 %v1187_v54 }
 0x4f6   : > { %2024 = vpow2.f32 %v1230_v47 }
 0x4f7   : > { %1310 = vrot.lane.b32.xlu0 %v2550_v59, %s2269_s16 }
 0x4fc   : > { %v2025_v48 = vpop.eup %2024 }
 0x4fd   : > { %v1232_v49 = vsel %vm829_vm9, %v2025_v48, 0.0  ;;  %v1235_v52 = vpack.c.bf16 %v2025_v48, %v2025_v48 }
 0x4fe   : > { %1233 = vadd.xlane.f32.xlu1 %v1232_v49 }
 0x504   : > { %1279 = vrot.lane.b32.xlu2 %v2550_v59, %s2270_s21 }
 0x509   : > { %v1237_v50 = vpop.permute.xlu1 %1236 }
 0x50a   : > { %v1242_v51 = vsel %vm864_vm10, %v1237_v50, 0 }
 0x50b   : > { %1251 = vmatpush.bf16.msra.mxu0 %v1242_v51 }
 0x50c   : > { %1356 = vrot.lane.b32.xlu2 %v2554_v0, %s2270_s21 }
 0x50e   : > { %1845 = vmatmul.msk.bf16.vlgmr.msra.gmra.mxu0 %vm829_vm9, %v1235_v52  ;;  %v822_v52 = vld [vmem:[%s2490_s11 + $0xc] sm:$0xf] }
 0x50f   : > { %v1338_v53 = vsel %vm864_vm10, %v822_v52, 0  ;;  %v1999_v52 = vld [vmem:[%s685_s30] ss:$0 sm:$0xff] }
 0x510   : > { %1347 = vmatpush.bf16.msrb.mxu0 %v1338_v53 }
 0x514   : > { %1354 = vrot.lane.b32.xlu2 %v2554_v0, %s2268_s13 }
 0x54e   : > { %v1068_v55 = vpop.xlane.xlu0 %1067 }
 0x54f   : > { %2026 = vrcp.f32 %v1068_v55 }
 0x555   : > { %v2027_v56 = vpop.eup %2026 }
 0x559   : > { %v1087_v59 = vpop.f32.mrf.mxu1 }
 0x55a   : > { %v1092_v57 = vmul.f32 %v2027_v56, %v1087_v59 }
 0x55c   : > { %v1093_v58 = vpack.c.bf16 %v1092_v57, %v1092_v57 }
 0x55e   : > { %1839 = vmatmul.msk.bf16.vlgmr.msra.gmra.mxu3 %vm829_vm9, %v1093_v58 }
 0x55f   : > { %v1157_v60 = vpop.xlane.xlu2 %1156 }
 0x560   : > { %2028 = vrcp.f32 %v1157_v60 }
 0x561   : > { %v1278_v61 = vpop.permute.xlu0 %1277  ;;  %v1089_v62 = vpop.f32.mrf.mxu1 }
 0x566   : > { %v2029_v5 = vpop.eup %2028 }
 0x567   : > { %v1280_v63 = vpop.permute.xlu2 %1279 }
 0x568   : > { %v1285_v1 = vsel %vm829_vm9, %v1280_v63, 0 }
 0x569   : > { %v1311_v3 = vpop.permute.xlu0 %1310  ;;  %1294 = vmatpush.bf16.xpose.msra.mxu3 %v1285_v1 }
 0x56a   : > { %v1316_v6 = vsel %vm864_vm10, %v1311_v3, 0  ;;  %v1176_v8 = vpop.f32.mrf.mxu1 }
 0x56b   : > { %v1181_v9 = vmul.f32 %v2029_v5, %v1176_v8  ;;  %1325 = vmatpush.bf16.msrb.mxu2 %v1316_v6  ;;  %v1997_v8 = vld [vmem:[%s2778_s24] ss:$0 sm:$0xff] }
 0x56d   : > { %v1182_v10 = vpack.c.bf16 %v1181_v9, %v1181_v9 }
 0x56f   : > { %1843 = vmatmul.msk.bf16.vlgmr.msrb.gmra.mxu3 %vm829_vm9, %v1182_v10  ;;  %v1357_v11 = vpop.permute.xlu2 %1356  ;;  %1421 = vmatpush.bf16.msra.mxu2 %v1338_v53 }
 0x570   : > { %v1362_v13 = vsel %vm829_vm9, %v1357_v11, 0 }
 0x571   : > { %1371 = vmatpush.bf16.xpose.msrb.mxu1 %v1362_v13  ;;  %v1234_v18 = vpop.xlane.xlu1 %1233 }
 0x572   : > { %v1178_v14 = vpop.f32.mrf.mxu1  ;;  %2030 = vrcp.f32 %v1234_v18 }
 0x576   : > { %v1014_v15 = vpop.f32.mrf.mxu3 }
 0x577   : > { %v1355_v24 = vpop.permute.xlu2 %1354  ;;  %v1034_v27 = vadd.f32 %v2600_v7, %v1014_v15 }
 0x578   : > { %v2031_v19 = vpop.eup %2030 }
 0x57e   : > { %v1016_v17 = vpop.f32.mrf.mxu3 }
 0x57f   : > { %1847 = vmatmul.msk.bf16.vlgmr.msra.gmra.mxu3 %vm829_vm9, %v1278_v61 }
 0x58b   : > { %v1253_v20 = vpop.f32.mrf.mxu0 }
 0x58c   : > { %v1258_v21 = vmul.f32 %v2031_v19, %v1253_v20 }
 0x58e   : > { %v1259_v22 = vpack.c.bf16 %v1258_v21, %v1258_v21 }
 0x590   : > { %1846 = vmatmul.msk.bf16.vlgmr.msra.gmra.mxu1 %vm829_vm9, %v1259_v22 }
 0x593   : > { %v1255_v23 = vpop.f32.mrf.mxu0 }
 0x5a0   : > { %1850 = vmatmul.msk.bf16.vlgmr.msrb.gmra.mxu1 %vm829_vm9, %v1355_v24 }
 0x5e1   : > { %v1106_v25 = vpop.f32.mrf.mxu3 }
 0x5e2   : > { %v1123_v34 = vadd.f32 %v2604_v16, %v1106_v25 }
 0x5e9   : > { %v1108_v26 = vpop.f32.mrf.mxu3 }
 0x5f2   : > { %v1198_v28 = vpop.f32.mrf.mxu3 }
 0x5f3   : > { %v1202_v29 = vadd.f32 %v1198_v28, %v1034_v27 }
 0x5fa   : > { %v1200_v30 = vpop.f32.mrf.mxu3 }
 0x602   : > { %v1296_v31 = vpop.f32.mrf.mxu3 }
 0x603   : > { %v1300_v32 = vsel %vm829_vm9, %v1296_v31, -inf }
 0x604   : > { %1301 = vmax.xlane.f32.xlu2 %v1300_v32 }
 0x60a   : > { %v1298_v33 = vpop.f32.mrf.mxu3 }
 0x60d   : > { %v1272_v35 = vpop.f32.mrf.mxu1 }
 0x60e   : > { %v1276_v36 = vadd.f32 %v1272_v35, %v1123_v34  ;;  %v1890_v34 = vld [vmem:[%s2503_s10 + $0x8] sm:$0xff] }
 0x60f   : > { %1525 = vmatpush.bf16.msra.mxu0 %v1890_v34 }
 0x615   : > { %v1274_v37 = vpop.f32.mrf.mxu1 }
 0x61d   : > { %v1373_v38 = vpop.f32.mrf.mxu1 }
 0x61e   : > { %v1377_v39 = vsel %vm829_vm9, %v1373_v38, -inf }
 0x61f   : > { %1378 = vmax.xlane.f32.xlu1 %v1377_v39 }
 0x625   : > { %v1375_v40 = vpop.f32.mrf.mxu1 }
 0x638   : > { %1387 = vrot.lane.b32.xlu1 %v2554_v0, %s2269_s16 }
 0x677   : > { %v1302_v7 = vpop.xlane.xlu2 %1301 }
 0x678   : > { %v1303_v41 = vsub.f32 %v1296_v31, %v1302_v7 }
 0x67a   : > { %v1304_v42 = vmul.f32 1.442695, %v1303_v41 }
 0x67c   : > { %2032 = vpow2.f32 %v1304_v42 }
 0x682   : > { %v2033_v43 = vpop.eup %2032 }
 0x683   : > { %v1309_v44 = vpack.c.bf16 %v2033_v43, %v2033_v43  ;;  %v1306_v16 = vsel %vm829_vm9, %v2033_v43, 0.0 }
 0x684   : > { %1307 = vadd.xlane.f32.xlu1 %v1306_v16 }
 0x685   : > { %1848 = vmatmul.msk.bf16.vlgmr.msrb.gmra.mxu2 %vm829_vm9, %v1309_v44 }
 0x692   : > { %v1379_v45 = vpop.xlane.xlu1 %1378 }
 0x693   : > { %v1380_v46 = vsub.f32 %v1373_v38, %v1379_v45  ;;  %v1894_v38 = vld [vmem:[%s2517_s29 + $0x18] sm:$0xff] }
 0x694   : > { %1578 = vmatpush.bf16.msra.mxu1 %v1894_v38 }
 0x695   : > { %v1381_v47 = vmul.f32 1.442695, %v1380_v46 }
 0x697   : > { %2034 = vpow2.f32 %v1381_v47 }
 0x69d   : > { %v2035_v48 = vpop.eup %2034 }
 0x69e   : > { %v1383_v49 = vsel %vm829_vm9, %v2035_v48, 0.0  ;;  %v1386_v51 = vpack.c.bf16 %v2035_v48, %v2035_v48 }
 0x69f   : > { %1384 = vadd.xlane.f32.xlu0 %v1383_v49 }
 0x6aa   : > { %v1388_v0 = vpop.permute.xlu1 %1387 }
 0x6ab   : > { %v1393_v50 = vsel %vm864_vm10, %v1388_v0, 0 }
 0x6ac   : > { %1402 = vmatpush.bf16.msrb.mxu3 %v1393_v50 }
 0x6af   : > { %1851 = vmatmul.msk.bf16.vlgmr.msrb.gmra.mxu3 %vm829_vm9, %v1386_v51 }
 0x6f7   : > { %v1308_v54 = vpop.xlane.xlu1 %1307 }
 0x6f8   : > { %2036 = vrcp.f32 %v1308_v54 }
 0x6fe   : > { %v2037_v55 = vpop.eup %2036 }
 0x708   : > { %v1327_v56 = vpop.f32.mrf.mxu2 }
 0x709   : > { %v1332_v59 = vmul.f32 %v2037_v55, %v1327_v56 }
 0x70b   : > { %v1333_v57 = vpack.c.bf16 %v1332_v59, %v1332_v59 }
 0x70d   : > { %1849 = vmatmul.msk.bf16.vlgmr.msrb.gmra.mxu0 %vm829_vm9, %v1333_v57 }
 0x710   : > { %v1329_v58 = vpop.f32.mrf.mxu2 }
 0x711   : > { %v1893_v58 = vld [vmem:[%s2517_s29 + $0x10] sm:$0xff] }
 0x712   : > { %v1385_v60 = vpop.xlane.xlu0 %1384  ;;  %1579 = vmatpush.bf16.msra.mxu1 %v1893_v58 }
 0x713   : > { %2038 = vrcp.f32 %v1385_v60  ;;  %v1892_v60 = vld [vmem:[%s2517_s29 + $0x8] sm:$0xff] }
 0x716   : > { %1580 = vmatpush.bf16.msra.mxu1 %v1892_v60 }
 0x719   : > { %v2039_v61 = vpop.eup %2038 }
 0x732   : > { %v1404_v62 = vpop.f32.mrf.mxu3 }
 0x733   : > { %v1409_v63 = vmul.f32 %v2039_v61, %v1404_v62  ;;  %v1891_v61 = vld [vmem:[%s2517_s29] sm:$0xff]  ;;  %s2271_s29 = smov [#allocation10]  }
 0x734   : > { %1581 = vmatpush.bf16.msra.mxu1 %v1891_v61 }
 0x735   : > { %v1410_v1 = vpack.c.bf16 %v1409_v63, %v1409_v63  ;;  %v2000_v63 = vld [vmem:[%s693_s2] ss:$0 sm:$0xff]  ;;  %s1600_s2 = sshll.u32 %s2271_s29, 4  ;;  %s1601_s2 = int_to_ptr.vmem [resolvable:$true] %s1600_s2 }
 0x737   : > { %1852 = vmatmul.msk.bf16.vlgmr.msra.gmra.mxu2 %vm829_vm9, %v1410_v1 }
 0x73a   : > { %v1406_v3 = vpop.f32.mrf.mxu3 }
 0x78a   : > { %v1349_v5 = vpop.f32.mrf.mxu0 }
 0x78b   : > { %v1353_v6 = vadd.f32 %v1349_v5, %v1202_v29 }
 0x78d   : > { %v1428_v9 = vadd.f32 %v1353_v6, %v2520_v2 }
 0x78f   : > { %v1432_v10 = vadd.f32 %v1997_v8, %v1428_v9 }
 0x791   : > { %1433 = vst.msk [vmem:[#allocation10] sm:$0xff] %vm717_vm1, %v1432_v10 }
 0x792   : > { %v1351_v11 = vpop.f32.mrf.mxu0 }
 0x798   : > { %v2659_v13 = vld [vmem:[#allocation10] sm:$0xff] }
 0x799   : > { %v1441_v14 = vsel %vm717_vm1, %v2659_v13, 0.0 }
 0x79a   : > { %1442 = vadd.xlane.f32.xlu2 %v1441_v14 }
 0x7ba   : > { %v1423_v15 = vpop.f32.mrf.mxu2 }
 0x7bb   : > { %v1427_v17 = vadd.f32 %v1423_v15, %v1276_v36  ;;  %v1889_v36 = vld [vmem:[%s2503_s10] sm:$0xff]  ;;  %s2779_s10 = scalar_lea.vmem [#allocation8], %s2459_s1 }
 0x7bc   : > { %1526 = vmatpush.bf16.msra.mxu0 %v1889_v36 }
 0x7bd   : > { %v1434_v18 = vadd.f32 %v1427_v17, %v2524_v4 }
 0x7bf   : > { %v1435_v19 = vadd.f32 %v1997_v8, %v1434_v18  ;;  %v2001_v8 = vld [vmem:[%s701_s7] ss:$0 sm:$0xff]  ;;  %s2272_s7 = smov 128  }
 0x7c1   : > { %1436 = vst.msk [vmem:[#allocation10 + $0x8] sm:$0xff] %vm717_vm1, %v1435_v19 }
 0x7c2   : > { %v1425_v20 = vpop.f32.mrf.mxu2 }
 0x7c8   : > { %v2665_v21 = vld [vmem:[#allocation10 + $0x8] sm:$0xff] }
 0x7c9   : > { %v1444_v2 = vsel %vm717_vm1, %v2665_v21, 0.0 }
 0x7ca   : > { %1445 = vadd.xlane.f32.xlu2 %v1444_v2 }
 0x80d   : > { %v1443_v22 = vpop.xlane.xlu2 %1442 }
 0x80e   : > { %v1447_v23 = vmul.f32 %v1443_v22, %v2528_v12 }
 0x810   : > { %v1449_v24 = vsub.f32 %v2659_v13, %v1447_v23 }
 0x812   : > { %v1451_v25 = vmul.f32 %v1449_v24, %v1449_v24 }
 0x814   : > { %v1453_v4 = vsel %vm717_vm1, %v1451_v25, 0.0 }
 0x815   : > { %1454 = vadd.xlane.f32.xlu2 %v1453_v4 }
 0x83d   : > { %v1446_v26 = vpop.xlane.xlu2 %1445 }
 0x83e   : > { %v1448_v27 = vmul.f32 %v1446_v26, %v2528_v12 }
 0x840   : > { %v1450_v28 = vsub.f32 %v2665_v21, %v1448_v27 }
 0x842   : > { %v1452_v29 = vmul.f32 %v1450_v28, %v1450_v28 }
 0x844   : > { %v1456_v30 = vsel %vm717_vm1, %v1452_v29, 0.0 }
 0x845   : > { %1457 = vadd.xlane.f32.xlu0 %v1456_v30 }
 0x888   : > { %v1455_v31 = vpop.xlane.xlu2 %1454 }
 0x889   : > { %v1459_v32 = vmul.f32 %v1455_v31, %v2528_v12 }
 0x88b   : > { %v1461_v33 = vadd.f32 1e-05, %v1459_v32 }
 0x88d   : > { %2040 = vrsqrt.f32 %v1461_v33  ;;  %vm1469_vm12 = vweird.f32 %v1461_v33 }
 0x893   : > { %v2041_v35 = vpop.eup %2040 }
 0x894   : > { %v1464_v37 = vmul.f32 %v2041_v35, %v1461_v33  ;;  %vm1470_vm11 = vweird.f32 %v2041_v35 }
 0x895   : > { %vm1471_vm13 = vmor %vm1469_vm12, %vm1470_vm11 }
 0x896   : > { %v1465_v39 = vmul.f32 %v2041_v35, %v1464_v37 }
 0x898   : > { %v1466_v42 = vmul.f32 0.5, %v1465_v39 }
 0x89a   : > { %v1467_v43 = vsub.f32 1.5, %v1466_v42 }
 0x89c   : > { %v1468_v16 = vmul.f32 %v2041_v35, %v1467_v43 }
 0x89e   : > { %v1472_v47 = vsel %vm1471_vm13, %v2041_v35, %v1468_v16 }
 0x89f   : > { %v1483_v0 = vmul.f32 %v1472_v47, %v1449_v24 }
 0x8b8   : > { %v1458_v40 = vpop.xlane.xlu0 %1457 }
 0x8b9   : > { %v1460_v7 = vmul.f32 %v1458_v40, %v2528_v12  ;;  %v1998_v12 = vld [vmem:[%s2779_s10] ss:$0 sm:$0xff] }
 0x8ba   : > { %v1488_v53 = vmul.f32 %v1998_v12, %v1483_v0 }
 0x8bb   : > { %v1462_v41 = vadd.f32 1e-05, %v1460_v7 }
 0x8bc   : > { %v1493_v56 = vadd.f32 %v1999_v52, %v1488_v53 }
 0x8bd   : > { %2042 = vrsqrt.f32 %v1462_v41  ;;  %vm1479_vm15 = vweird.f32 %v1462_v41 }
 0x8c3   : > { %v2043_v44 = vpop.eup %2042 }
 0x8c4   : > { %v1474_v45 = vmul.f32 %v2043_v44, %v1462_v41  ;;  %vm1480_vm14 = vweird.f32 %v2043_v44 }
 0x8c5   : > { %vm1481_vm0 = vmor %vm1479_vm15, %vm1480_vm14 }
 0x8c6   : > { %v1475_v46 = vmul.f32 %v2043_v44, %v1474_v45 }
 0x8c8   : > { %v1476_v48 = vmul.f32 0.5, %v1475_v46 }
 0x8ca   : > { %v1477_v49 = vsub.f32 1.5, %v1476_v48 }
 0x8cc   : > { %v1478_v50 = vmul.f32 %v2043_v44, %v1477_v49 }
 0x8ce   : > { %v1482_v51 = vsel %vm1481_vm0, %v2043_v44, %v1478_v50 }
 0x8cf   : > { %v1484_v54 = vmul.f32 %v1482_v51, %v1450_v28 }
 0x8d1   : > { %v1489_v55 = vmul.f32 %v1998_v12, %v1484_v54 }
 0x8d3   : > { %v1494_v59 = vadd.f32 %v1999_v52, %v1489_v55 }
 0x8d5   : > { %v1495_v57 = vpack.c.bf16 %v1494_v59, %v1493_v56 }
 0x8d7   : > { %1861 = vmatmul.msk.bf16.vlgmr.msra.gmra.mxu0 %vm717_vm1, %v1495_v57 }
 0x954   : > { %v1528_v62 = vpop.f32.mrf.mxu0 }
 0x955   : > { %v1529_v3 = vadd.f32 %v2000_v63, %v1528_v62 }
 0x95c   : > { %v1530_v1 = vpop.f32.mrf.mxu0 }
 0x95d   : > { %v1531_v5 = vadd.f32 %v2000_v63, %v1530_v1 }
 0x95f   : > { %v1533_v6 = vpack.c.bf16 %v1531_v5, %v1529_v3 }
 0x961   : > { %1878 = vmatmul.msk.bf16.vlgmr.msra.gmra.mxu1 %vm1570_vm2, %v1533_v6 }
 0x9de   : > { %v1583_v9 = vpop.f32.mrf.mxu1 }
 0x9df   : > { %v1584_v10 = vadd.f32 %v2001_v8, %v1583_v9 }
 0x9e1   : > { %v1588_v11 = vadd.f32 %v1584_v10, %v2659_v13 }
 0x9e3   : > { %1590 = vst.msk [vmem:[#allocation10] sm:$0xff] %vm717_vm1, %v1588_v11 }
 0x9e6   : > { %v1585_v14 = vpop.f32.mrf.mxu1 }
 0x9e7   : > { %v1586_v15 = vadd.f32 %v2001_v8, %v1585_v14 }
 0x9e9   : > { %v1589_v17 = vadd.f32 %v1586_v15, %v2665_v21 }
 0x9eb   : > { %1591 = vst.msk [vmem:[#allocation10 + $0x8] sm:$0xff] %vm717_vm1, %v1589_v17 }
 0x9ec   : > { %1906 = dma.vmem_to_hbm [thread:$0]  (%p1926_p3), %s1601_s2, 256, %s1603_s27, [#allocation4], %s2272_s7, %s2272_s7, %s2273_s19  }
 0x9ed   : > { %2229 = dma.done.wait (%p1926_p3), [#allocation4], 256  }
 0x9ee   : > { %2231 = vsyncadd (%p1926_p3), [#allocation4], 4294967040 }
 0x9ef PF: > { %s2783_s17 = sld [smem:[#allocation17_spill]]  ;;  %s2788_s25 = smov %s2238_s26 }
 0x9f0   : > { %s2784_s15 = sld [smem:[#allocation15_spill]] }
 0x9f1   : > { %s2785_s27 = sld [smem:[#allocation19_spill]] }
 0x9f2   : > { %s2786_s28 = sld [smem:[#allocation16_spill]] }
 0x9f3   : > { %s2787_s29 = sld [smem:[#allocation18_spill]] }
 0x9f5   : > { %s31_s30 = sadd.s32 1, %s2783_s17  }
 0x9f6   : > { %p28_p4 = scmp.ge.s32.totalorder %s31_s30, 4   ;;  %s2789_s26 = smov %s2784_s15 }
 0x9f8   :  { %30 = sbr.rel (!%p28_p4) target bundleno = 20 (0x14), region = 171 }
 0x9fd   :  { %1619 = vsyncpa [#allocation3], 1 }
 0x9fe   :  { %1621 = vsyncpa [#allocation3 + $0x1], 1 }
 0x9ff   :  { %1622 = vsyncpa [#allocation6], 1 }
 0xa00   :  { %1624 = vsyncpa [#allocation6 + $0x1], 1 }
 0xa01   :  { %1625 = vsyncpa [#allocation9], 1 }
 0xa02   :  { %1627 = vsyncpa [#allocation9 + $0x1], 1 }
 0xa03   :  { %1628 = vsyncpa [#allocation4], 1 }
 0xa04   :  { %1630 = vsyncpa [#allocation4 + $0x1], 1 }

</bundles_post_ra>
